<compile_context>
chip_gen: v7x
topology: tpu7x:2x2x1
jax: 0.10.0
libtpu: 0.0.40
codegen_flags: <defaults>
</compile_context>

<pallas_src>
import functools

import jax
import jax.numpy as jnp
from jax.experimental import pallas as pl
from jax.experimental.pallas import tpu as pltpu

LANE = 128
TILE = 512          # A-tile granularity; the node dim is padded to this.


# ---------------------------------------------------------------------------
# Kernels
# ---------------------------------------------------------------------------
def xw_kernel(x_ref, w_ref, o_ref):
    # (tm, Cin_p) @ (Cin_p, C_p) -> bf16 (tm, C_p), f32 accumulation on MXU.
    o_ref[...] = jnp.dot(x_ref[...], w_ref[...],
                         preferred_element_type=jnp.float32).astype(o_ref.dtype)


def agg_relu_kernel(a_ref, xw_ref, b_ref, o_ref, acc_ref, *, tm, tk, valid_n):
    # out[i] = ReLU( sum_k A[i, k*tk:(k+1)*tk] @ XW[k*tk:(k+1)*tk] + b )
    # XW is VMEM-resident (constant index_map) and sliced per reduction step.
    i = pl.program_id(0)
    k = pl.program_id(1)

    @pl.when(k == 0)
    def _():
        acc_ref[...] = jnp.zeros_like(acc_ref)

    ks = pl.multiple_of(k * tk, tk)
    acc_ref[...] += jnp.dot(a_ref[...], xw_ref[pl.ds(ks, tk), :],
                            preferred_element_type=jnp.float32)

    @pl.when(k == pl.num_programs(1) - 1)
    def _():
        h = jnp.maximum(acc_ref[...] + b_ref[...], 0.0)    # bias + ReLU in f32
        # Zero padded node rows so downstream never sees ReLU(bias) garbage.
        row = i * tm + jax.lax.broadcasted_iota(jnp.int32, h.shape, 0)
        o_ref[...] = jnp.where(row < valid_n, h, 0.0).astype(o_ref.dtype)


def agg_pool_head_kernel(a_ref, xw_ref, b_ref, oh_ref, inv_ref, wm_ref, bm_ref,
                         o_ref, acc_ref, pool_ref, *, tm, tk, valid_n):
    # Layer-2 aggregation fused with global_mean_pool and the linear head:
    #   H2_i    = ReLU(sum_k A[i, k] @ XW2[k] + b2)          (never hits HBM)
    #   pooled += onehot[:, i-tile] @ H2_i
    #   out     = (pooled * 1/count) @ Wm + bm               (last grid step)
    i = pl.program_id(0)
    k = pl.program_id(1)
    ni = pl.num_programs(0)
    nk = pl.num_programs(1)

    @pl.when(jnp.logical_and(i == 0, k == 0))
    def _():
        pool_ref[...] = jnp.zeros_like(pool_ref)

    @pl.when(k == 0)
    def _():
        acc_ref[...] = jnp.zeros_like(acc_ref)

    ks = pl.multiple_of(k * tk, tk)
    acc_ref[...] += jnp.dot(a_ref[...], xw_ref[pl.ds(ks, tk), :],
                            preferred_element_type=jnp.float32)

    @pl.when(k == nk - 1)
    def _():
        h = jnp.maximum(acc_ref[...] + b_ref[...], 0.0)
        row = i * tm + jax.lax.broadcasted_iota(jnp.int32, h.shape, 0)
        h = jnp.where(row < valid_n, h, 0.0)
        pool_ref[...] += jnp.dot(oh_ref[...], h.astype(jnp.bfloat16),
                                 preferred_element_type=jnp.float32)

    @pl.when(jnp.logical_and(i == ni - 1, k == nk - 1))
    def _():
        pooled = pool_ref[...] * inv_ref[...]              # mean division, f32
        o_ref[...] = jnp.dot(pooled.astype(jnp.bfloat16), wm_ref[...],
                             preferred_element_type=jnp.float32) + bm_ref[...]


# ---------------------------------------------------------------------------
# Pallas wrappers
# ---------------------------------------------------------------------------
def _round_up(x, m):
    return (x + m - 1) // m * m


def _pad2d(x, rows, cols):
    return jnp.pad(x, ((0, rows - x.shape[0]), (0, cols - x.shape[1])))


def _vmem_limit(nbytes):
    # Needed bytes + headroom; never below 16 MiB, capped under v7x's 64 MiB.
    return int(min(max(nbytes + (4 << 20), 16 << 20), 56 << 20))


def _xw_prepass(x_bf16, w_bf16, *, tm):
    """XW = X @ W (small K) as a separate gridded pre-pass."""
    n_pad, cin = x_bf16.shape
    c = w_bf16.shape[1]
    return pl.pallas_call(
        xw_kernel,
        out_shape=jax.ShapeDtypeStruct((n_pad, c), jnp.bfloat16),
        grid_spec=pltpu.PrefetchScalarGridSpec(
            num_scalar_prefetch=0,
            grid=(n_pad // tm,),
            in_specs=[pl.BlockSpec((tm, cin), lambda i: (i, 0)),
                      pl.BlockSpec((cin, c), lambda i: (0, 0))],
            out_specs=pl.BlockSpec((tm, c), lambda i: (i, 0))),
        compiler_params=pltpu.CompilerParams(
            dimension_semantics=("parallel",)),
    )(x_bf16, w_bf16)


def gcn_conv_layer(a_bf16, x_bf16, w_bf16, b_f32, *, tm, tk, valid_n):
    """ReLU(A_hat @ (X @ W) + b); A is streamed, XW stays VMEM-resident."""
    n_pad = a_bf16.shape[0]
    c = w_bf16.shape[1]

    xw = _xw_prepass(x_bf16, w_bf16, tm=tm)                  # (n_pad, c) bf16

    vmem = (2 * tm * tk * 2            # A tiles (double buffered)
            + 2 * n_pad * c * 2        # resident XW (counted with both bufs)
            + 2 * c * 4                # bias
            + 2 * tm * c * 2           # output tiles
            + tm * c * 4)              # f32 accumulator
    flops = 2.0 * n_pad * n_pad * c
    bytes_accessed = 2 * (n_pad * n_pad + 2 * n_pad * c) + 4 * c
    kern = functools.partial(agg_relu_kernel, tm=tm, tk=tk, valid_n=valid_n)
    return pl.pallas_call(
        kern,
        out_shape=jax.ShapeDtypeStruct((n_pad, c), jnp.bfloat16),
        grid_spec=pltpu.PrefetchScalarGridSpec(
            num_scalar_prefetch=0,
            grid=(n_pad // tm, n_pad // tk),
            in_specs=[pl.BlockSpec((tm, tk), lambda i, k: (i, k)),
                      pl.BlockSpec((n_pad, c), lambda i, k: (0, 0)),  # resident
                      pl.BlockSpec((1, c), lambda i, k: (0, 0))],
            out_specs=pl.BlockSpec((tm, c), lambda i, k: (i, 0)),
            scratch_shapes=[pltpu.VMEM((tm, c), jnp.float32)]),
        compiler_params=pltpu.CompilerParams(
            dimension_semantics=("parallel", "arbitrary"),
            vmem_limit_bytes=_vmem_limit(vmem)),
        cost_estimate=pl.CostEstimate(flops=int(flops), transcendentals=0,
                                      bytes_accessed=int(bytes_accessed)),
    )(a_bf16, xw, b_f32)


def gcn_conv_pool_head(a_bf16, h1_bf16, w2_bf16, b2_f32, oh_bf16, inv_f32,
                       wm_bf16, bm_f32, *, tm, tk, valid_n):
    """Layer-2 GCNConv + ReLU fused with global_mean_pool and the linear head."""
    n_pad = a_bf16.shape[0]
    c = w2_bf16.shape[1]
    g_pad = oh_bf16.shape[0]
    head = wm_bf16.shape[1]

    xw = _xw_prepass(h1_bf16, w2_bf16, tm=tm)                # (n_pad, c) bf16

    vmem = (2 * tm * tk * 2 + 2 * n_pad * c * 2 + 2 * c * 4
            + 2 * g_pad * tm * 2 + 2 * g_pad * 4 + 2 * c * head * 2
            + 2 * head * 4 + 2 * g_pad * head * 4
            + tm * c * 4 + g_pad * c * 4)
    flops = 2.0 * n_pad * n_pad * c + 2.0 * g_pad * n_pad * c
    bytes_accessed = (2 * (n_pad * n_pad + n_pad * c + g_pad * n_pad)
                      + 4 * g_pad * head)
    kern = functools.partial(agg_pool_head_kernel, tm=tm, tk=tk, valid_n=valid_n)
    return pl.pallas_call(
        kern,
        out_shape=jax.ShapeDtypeStruct((g_pad, head), jnp.float32),
        grid_spec=pltpu.PrefetchScalarGridSpec(
            num_scalar_prefetch=0,
            grid=(n_pad // tm, n_pad // tk),
            in_specs=[pl.BlockSpec((tm, tk), lambda i, k: (i, k)),
                      pl.BlockSpec((n_pad, c), lambda i, k: (0, 0)),  # resident
                      pl.BlockSpec((1, c), lambda i, k: (0, 0)),
                      pl.BlockSpec((g_pad, tm), lambda i, k: (0, i)),
                      pl.BlockSpec((g_pad, 1), lambda i, k: (0, 0)),
                      pl.BlockSpec((c, head), lambda i, k: (0, 0)),
                      pl.BlockSpec((1, head), lambda i, k: (0, 0))],
            out_specs=pl.BlockSpec((g_pad, head), lambda i, k: (0, 0)),
            scratch_shapes=[pltpu.VMEM((tm, c), jnp.float32),      # per-row acc
                            pltpu.VMEM((g_pad, c), jnp.float32)]),  # pooled acc
        compiler_params=pltpu.CompilerParams(
            # pooled accumulator reduces over the dst-row axis too -> arbitrary
            dimension_semantics=("arbitrary", "arbitrary"),
            vmem_limit_bytes=_vmem_limit(vmem)),
        cost_estimate=pl.CostEstimate(flops=int(flops), transcendentals=0,
                                      bytes_accessed=int(bytes_accessed)),
    )(a_bf16, xw, b2_f32, oh_bf16, inv_f32, wm_bf16, bm_f32)


# ---------------------------------------------------------------------------
# Glue: normalized adjacency / pooling matrix / padding (plain JAX)
# ---------------------------------------------------------------------------
def build_norm_adj_padded(edge_index, edge_weight, num_nodes, n_pad):
    """Symmetric-normalized adjacency (with self loops) built directly at the
    padded shape; dinv scaling + bf16 cast fused into one pass over A."""
    # edge_weights[edge_weights < 0] = 0
    ew = jnp.where(edge_weight < 0, 0.0, edge_weight).astype(jnp.float32)
    src, dst = edge_index[0], edge_index[1]
    loop = jnp.arange(num_nodes, dtype=edge_index.dtype)
    src = jnp.concatenate([src, loop])
    dst = jnp.concatenate([dst, loop])
    ew = jnp.concatenate([ew, jnp.ones((num_nodes,), jnp.float32)])
    # A[i, j] = sum of weights on edges j -> i, scattered straight into pad.
    adj = jnp.zeros((n_pad, n_pad), jnp.float32).at[dst, src].add(ew)
    deg = adj.sum(axis=1)                                  # weighted in-degree
    dinv = jnp.where(deg > 0, jax.lax.rsqrt(deg), 0.0)
    return (dinv[:, None] * adj * dinv[None, :]).astype(jnp.bfloat16)


@functools.partial(jax.jit, static_argnames=("num_graphs",))
def gcn_forward(x, edge_index, edge_weight, batch, params, num_graphs):
    w1, b1, w2, b2, wm, bm = params
    n, cin = x.shape
    hid = w1.shape[1]
    cout = w2.shape[1]

    # Lane-dense padded channel dims; node dim padded to a full A-tile.
    cin_p = _round_up(cin, LANE)
    hid_p = _round_up(hid, LANE)
    cout_p = _round_up(cout, LANE)
    head_p = _round_up(2, LANE)
    n_p = _round_up(max(n, 1), TILE)
    tk = TILE
    tm = TILE if n_p >= 2 * TILE else TILE // 2   # keep >=2 dst-row tiles (v7x)

    a_p = build_norm_adj_padded(edge_index, edge_weight, n, n_p)

    x_p = _pad2d(x.astype(jnp.float32), n_p, cin_p).astype(jnp.bfloat16)
    w1_p = _pad2d(w1, cin_p, hid_p).astype(jnp.bfloat16)
    b1_p = _pad2d(b1.reshape(1, -1), 1, hid_p).astype(jnp.float32)
    w2_p = _pad2d(w2, hid_p, cout_p).astype(jnp.bfloat16)
    b2_p = _pad2d(b2.reshape(1, -1), 1, cout_p).astype(jnp.float32)
    wm_p = _pad2d(wm, cout_p, head_p).astype(jnp.bfloat16)
    bm_p = _pad2d(bm.reshape(1, -1), 1, head_p).astype(jnp.float32)

    # Mean pooling = (one-hot @ H2) * 1/count (sum via bf16 matmul, f32 divide).
    g_p = _round_up(num_graphs, 8)
    onehot = (batch[None, :] == jnp.arange(num_graphs)[:, None]).astype(jnp.float32)
    counts = onehot.sum(axis=1, keepdims=True)
    inv_counts = jnp.where(counts > 0, 1.0 / counts, 0.0)
    onehot_p = _pad2d(onehot, g_p, n_p).astype(jnp.bfloat16)
    inv_p = _pad2d(inv_counts, g_p, 1).astype(jnp.float32)

    h1 = gcn_conv_layer(a_p, x_p, w1_p, b1_p, tm=tm, tk=tk, valid_n=n)
    out = gcn_conv_pool_head(a_p, h1, w2_p, b2_p, onehot_p, inv_p, wm_p, bm_p,
                             tm=tm, tk=tk, valid_n=n)
    return out[:num_graphs, :2]


# ---------------------------------------------------------------------------
if __name__ == "__main__":
    key = jax.random.PRNGKey(0)

    # small shapes consistent with the module
    num_nodes = 16
    num_edges = 24
    in_channels, hid_channels, out_channels = 8, 32, 16
    num_graphs = 2

    k = jax.random.split(key, 10)

    # graph data
    x = jax.random.normal(k[0], (num_nodes, in_channels), jnp.float32)
    src = jax.random.randint(k[1], (num_edges,), 0, num_nodes)
    dst = jax.random.randint(k[2], (num_edges,), 0, num_nodes)
    edge_index = jnp.stack([src, dst], axis=0)                        # (2, E)
    edge_weight = jax.random.normal(k[3], (num_edges,), jnp.float32)  # incl. negatives
    batch = (jnp.arange(num_nodes) >= num_nodes // 2).astype(jnp.int32)  # 2 graphs

    # deterministic parameters (GCNConv.lin has no bias; GCNConv adds its own)
    w1 = jax.random.normal(k[4], (in_channels, hid_channels), jnp.float32) * 0.1
    b1 = jax.random.normal(k[5], (1, hid_channels), jnp.float32) * 0.1
    w2 = jax.random.normal(k[6], (hid_channels, out_channels), jnp.float32) * 0.1
    b2 = jax.random.normal(k[7], (1, out_channels), jnp.float32) * 0.1
    wm = jax.random.normal(k[8], (out_channels, 2), jnp.float32) * 0.1
    bm = jax.random.normal(k[9], (1, 2), jnp.float32) * 0.1

    params = (w1, b1, w2, b2, wm, bm)
    out = gcn_forward(x, edge_index, edge_weight, batch, params, num_graphs)
    jax.block_until_ready(out)
    assert out.shape == (num_graphs, 2)
    print("KERNEL_OK")
</pallas_src>

<mosaic_0001>
module attributes {stable_mosaic.version = 11 : i64} {
  func.func @agg_relu_kernel(%arg0: i32, %arg1: i32, %arg2: memref<256x512xbf16, #tpu.memory_space<vmem>>, %arg3: memref<512x128xbf16, #tpu.memory_space<vmem>>, %arg4: memref<1x128xf32, #tpu.memory_space<vmem>>, %arg5: memref<256x128xbf16, #tpu.memory_space<vmem>>, %arg6: memref<256x128xf32, #tpu.memory_space<vmem>>) attributes {dimension_semantics = [#tpu.dimension_semantics<parallel>, #tpu.dimension_semantics<arbitrary>], iteration_bounds = array<i64: 2, 1>, scalar_prefetch = 0 : i64, scratch_operands = 1 : i64, tpu.core_type = #tpu.core_type<tc>, window_params = [{transform_indices = @transform_0, window_bounds = array<i64: 256, 512>}, {pipeline_mode = #tpu.pipeline_mode<synchronous>, transform_indices = @transform_1, window_bounds = array<i64: 512, 128>}, {pipeline_mode = #tpu.pipeline_mode<synchronous>, transform_indices = @transform_2, window_bounds = array<i64: 1, 128>}, {transform_indices = @transform_3, window_bounds = array<i64: 256, 128>}]} {
    %c0_i32 = arith.constant 0 : i32
    %0 = arith.cmpi eq, %arg1, %c0_i32 : i32
    %1 = arith.extui %0 : i1 to i32
    %c0_i32_0 = arith.constant 0 : i32
    %2 = arith.cmpi ne, %1, %c0_i32_0 : i32
    scf.if %2 {
      %cst_9 = arith.constant 0.000000e+00 : f32
      %15 = vector.broadcast %cst_9 : f32 to vector<256x128xf32>
      %c0_10 = arith.constant 0 : index
      %c0_11 = arith.constant 0 : index
      %16 = vector.load %arg6[%c0_10, %c0_11] : memref<256x128xf32, #tpu.memory_space<vmem>>, vector<256x128xf32>
      tpu.vector_store %arg6[%c0_10, %c0_11], %15 {strides = array<i32>} : memref<256x128xf32, #tpu.memory_space<vmem>>, vector<256x128xf32>,
    } else {
    }
    %c512_i32 = arith.constant 512 : i32
    %3 = arith.muli %arg1, %c512_i32 : i32
    %4 = tpu.assume_multiple %3, 512 : i32
    %c0 = arith.constant 0 : index
    %c0_1 = arith.constant 0 : index
    %5 = vector.load %arg6[%c0, %c0_1] : memref<256x128xf32, #tpu.memory_space<vmem>>, vector<256x128xf32>
    %c0_2 = arith.constant 0 : index
    %c0_3 = arith.constant 0 : index
    %6 = vector.load %arg2[%c0_2, %c0_3] : memref<256x512xbf16, #tpu.memory_space<vmem>>, vector<256x512xbf16>
    %7 = arith.index_cast %4 : i32 to index
    %c0_4 = arith.constant 0 : index
    %8 = vector.load %arg3[%7, %c0_4] : memref<512x128xbf16, #tpu.memory_space<vmem>>, vector<512x128xbf16>
    %cst = arith.constant dense<0.000000e+00> : vector<256x128xf32>
    %9 = tpu.matmul %6, %8, %cst {dimension_numbers = #tpu.dot_dimension_numbers<[1], [0], [0], [1], [0, 0, 1, 1], [], []>} : vector<256x512xbf16>, vector<512x128xbf16>, vector<256x128xf32> -> vector<256x128xf32>
    %10 = arith.addf %5, %9 : vector<256x128xf32>
    %c0_5 = arith.constant 0 : index
    %c0_6 = arith.constant 0 : index
    %11 = vector.load %arg6[%c0_5, %c0_6] : memref<256x128xf32, #tpu.memory_space<vmem>>, vector<256x128xf32>
    tpu.vector_store %arg6[%c0_5, %c0_6], %10 {strides = array<i32>} : memref<256x128xf32, #tpu.memory_space<vmem>>, vector<256x128xf32>,
    %c0_i32_7 = arith.constant 0 : i32
    %12 = arith.cmpi eq, %arg1, %c0_i32_7 : i32
    %13 = arith.extui %12 : i1 to i32
    %c0_i32_8 = arith.constant 0 : i32
    %14 = arith.cmpi ne, %13, %c0_i32_8 : i32
    scf.if %14 {
      %c0_9 = arith.constant 0 : index
      %c0_10 = arith.constant 0 : index
      %15 = vector.load %arg6[%c0_9, %c0_10] : memref<256x128xf32, #tpu.memory_space<vmem>>, vector<256x128xf32>
      %c0_11 = arith.constant 0 : index
      %c0_12 = arith.constant 0 : index
      %16 = vector.load %arg4[%c0_11, %c0_12] : memref<1x128xf32, #tpu.memory_space<vmem>>, vector<1x128xf32>
      %17 = vector.broadcast %16 : vector<1x128xf32> to vector<256x128xf32>
      %18 = arith.addf %15, %17 : vector<256x128xf32>
      %cst_13 = arith.constant 0.000000e+00 : f32
      %19 = vector.broadcast %cst_13 : f32 to vector<256x128xf32>
      %20 = arith.maximumf %18, %19 : vector<256x128xf32>
      %c256_i32 = arith.constant 256 : i32
      %21 = arith.muli %arg0, %c256_i32 : i32
      %22 = tpu.iota {dimensions = array<i32: 0>} : vector<256x128xi32>
      %23 = vector.broadcast %21 : i32 to vector<256x128xi32>
      %24 = arith.addi %23, %22 : vector<256x128xi32>
      %c16_i32 = arith.constant 16 : i32
      %25 = vector.broadcast %c16_i32 : i32 to vector<256x128xi32>
      %26 = arith.cmpi slt, %24, %25 : vector<256x128xi32>
      %cst_14 = arith.constant 0.000000e+00 : f32
      %27 = vector.broadcast %cst_14 : f32 to vector<256x128xf32>
      %28 = arith.select %26, %20, %27 : vector<256x128xi1>, vector<256x128xf32>
      %29 = arith.truncf %28 : vector<256x128xf32> to vector<256x128xbf16>
      %c0_15 = arith.constant 0 : index
      %c0_16 = arith.constant 0 : index
      %30 = vector.load %arg5[%c0_15, %c0_16] : memref<256x128xbf16, #tpu.memory_space<vmem>>, vector<256x128xbf16>
      tpu.vector_store %arg5[%c0_15, %c0_16], %29 {strides = array<i32>} : memref<256x128xbf16, #tpu.memory_space<vmem>>, vector<256x128xbf16>,
    } else {
    }
    return
  }
  func.func @transform_0(%arg0: i32, %arg1: i32) -> (i32, i32) {
    %c0_i32 = arith.constant 0 : i32
    return %arg0, %arg1 : i32, i32
  }
  func.func @transform_1(%arg0: i32, %arg1: i32) -> (i32, i32) {
    %c0_i32 = arith.constant 0 : i32
    %c0_i32_0 = arith.constant 0 : i32
    %c0_i32_1 = arith.constant 0 : i32
    return %c0_i32, %c0_i32_0 : i32, i32
  }
  func.func @transform_2(%arg0: i32, %arg1: i32) -> (i32, i32) {
    %c0_i32 = arith.constant 0 : i32
    %c0_i32_0 = arith.constant 0 : i32
    %c0_i32_1 = arith.constant 0 : i32
    return %c0_i32, %c0_i32_0 : i32, i32
  }
  func.func @transform_3(%arg0: i32, %arg1: i32) -> (i32, i32) {
    %c0_i32 = arith.constant 0 : i32
    %c0_i32_0 = arith.constant 0 : i32
    return %arg0, %c0_i32 : i32, i32
  }
}

module attributes {stable_mosaic.version = 11 : i64} {
  func.func @xw_kernel(%arg0: i32, %arg1: memref<256x128xbf16, #tpu.memory_space<vmem>>, %arg2: memref<128x128xbf16, #tpu.memory_space<vmem>>, %arg3: memref<256x128xbf16, #tpu.memory_space<vmem>>) attributes {dimension_semantics = [#tpu.dimension_semantics<parallel>], iteration_bounds = array<i64: 2>, scalar_prefetch = 0 : i64, scratch_operands = 0 : i64, tpu.core_type = #tpu.core_type<tc>, window_params = [{transform_indices = @transform_0, window_bounds = array<i64: 256, 128>}, {pipeline_mode = #tpu.pipeline_mode<synchronous>, transform_indices = @transform_1, window_bounds = array<i64: 128, 128>}, {transform_indices = @transform_2, window_bounds = array<i64: 256, 128>}]} {
    %c0 = arith.constant 0 : index
    %c0_0 = arith.constant 0 : index
    %0 = vector.load %arg1[%c0, %c0_0] : memref<256x128xbf16, #tpu.memory_space<vmem>>, vector<256x128xbf16>
    %c0_1 = arith.constant 0 : index
    %c0_2 = arith.constant 0 : index
    %1 = vector.load %arg2[%c0_1, %c0_2] : memref<128x128xbf16, #tpu.memory_space<vmem>>, vector<128x128xbf16>
    %cst = arith.constant dense<0.000000e+00> : vector<256x128xf32>
    %2 = tpu.matmul %0, %1, %cst {dimension_numbers = #tpu.dot_dimension_numbers<[1], [0], [0], [1], [0, 0, 1, 1], [], []>} : vector<256x128xbf16>, vector<128x128xbf16>, vector<256x128xf32> -> vector<256x128xf32>
    %3 = arith.truncf %2 : vector<256x128xf32> to vector<256x128xbf16>
    %c0_3 = arith.constant 0 : index
    %c0_4 = arith.constant 0 : index
    %4 = vector.load %arg3[%c0_3, %c0_4] : memref<256x128xbf16, #tpu.memory_space<vmem>>, vector<256x128xbf16>
    tpu.vector_store %arg3[%c0_3, %c0_4], %3 {strides = array<i32>} : memref<256x128xbf16, #tpu.memory_space<vmem>>, vector<256x128xbf16>,
    return
  }
  func.func @transform_0(%arg0: i32) -> (i32, i32) {
    %c0_i32 = arith.constant 0 : i32
    %c0_i32_0 = arith.constant 0 : i32
    return %arg0, %c0_i32 : i32, i32
  }
  func.func @transform_1(%arg0: i32) -> (i32, i32) {
    %c0_i32 = arith.constant 0 : i32
    %c0_i32_0 = arith.constant 0 : i32
    %c0_i32_1 = arith.constant 0 : i32
    return %c0_i32, %c0_i32_0 : i32, i32
  }
  func.func @transform_2(%arg0: i32) -> (i32, i32) {
    %c0_i32 = arith.constant 0 : i32
    %c0_i32_0 = arith.constant 0 : i32
    return %arg0, %c0_i32 : i32, i32
  }
}

module attributes {stable_mosaic.version = 11 : i64} {
  func.func @agg_pool_head_kernel(%arg0: i32, %arg1: i32, %arg2: memref<256x512xbf16, #tpu.memory_space<vmem>>, %arg3: memref<512x128xbf16, #tpu.memory_space<vmem>>, %arg4: memref<1x128xf32, #tpu.memory_space<vmem>>, %arg5: memref<8x256xbf16, #tpu.memory_space<vmem>>, %arg6: memref<8x1xf32, #tpu.memory_space<vmem>>, %arg7: memref<128x128xbf16, #tpu.memory_space<vmem>>, %arg8: memref<1x128xf32, #tpu.memory_space<vmem>>, %arg9: memref<8x128xf32, #tpu.memory_space<vmem>>, %arg10: memref<256x128xf32, #tpu.memory_space<vmem>>, %arg11: memref<8x128xf32, #tpu.memory_space<vmem>>) attributes {dimension_semantics = [#tpu.dimension_semantics<arbitrary>, #tpu.dimension_semantics<arbitrary>], iteration_bounds = array<i64: 2, 1>, scalar_prefetch = 0 : i64, scratch_operands = 2 : i64, tpu.core_type = #tpu.core_type<tc>, window_params = [{transform_indices = @transform_0, window_bounds = array<i64: 256, 512>}, {pipeline_mode = #tpu.pipeline_mode<synchronous>, transform_indices = @transform_1, window_bounds = array<i64: 512, 128>}, {pipeline_mode = #tpu.pipeline_mode<synchronous>, transform_indices = @transform_2, window_bounds = array<i64: 1, 128>}, {transform_indices = @transform_3, window_bounds = array<i64: 8, 256>}, {pipeline_mode = #tpu.pipeline_mode<synchronous>, transform_indices = @transform_4, window_bounds = array<i64: 8, 1>}, {pipeline_mode = #tpu.pipeline_mode<synchronous>, transform_indices = @transform_5, window_bounds = array<i64: 128, 128>}, {pipeline_mode = #tpu.pipeline_mode<synchronous>, transform_indices = @transform_6, window_bounds = array<i64: 1, 128>}, {pipeline_mode = #tpu.pipeline_mode<synchronous>, transform_indices = @transform_7, window_bounds = array<i64: 8, 128>}]} {
    %c0_i32 = arith.constant 0 : i32
    %0 = arith.cmpi eq, %arg0, %c0_i32 : i32
    %c0_i32_0 = arith.constant 0 : i32
    %1 = arith.cmpi eq, %arg1, %c0_i32_0 : i32
    %2 = arith.andi %0, %1 : i1
    %3 = arith.extui %2 : i1 to i32
    %c0_i32_1 = arith.constant 0 : i32
    %4 = arith.cmpi ne, %3, %c0_i32_1 : i32
    scf.if %4 {
      %cst_14 = arith.constant 0.000000e+00 : f32
      %25 = vector.broadcast %cst_14 : f32 to vector<8x128xf32>
      %c0_15 = arith.constant 0 : index
      %c0_16 = arith.constant 0 : index
      %26 = vector.load %arg11[%c0_15, %c0_16] : memref<8x128xf32, #tpu.memory_space<vmem>>, vector<8x128xf32>
      tpu.vector_store %arg11[%c0_15, %c0_16], %25 {strides = array<i32>} : memref<8x128xf32, #tpu.memory_space<vmem>>, vector<8x128xf32>,
    } else {
    }
    %c0_i32_2 = arith.constant 0 : i32
    %5 = arith.cmpi eq, %arg1, %c0_i32_2 : i32
    %6 = arith.extui %5 : i1 to i32
    %c0_i32_3 = arith.constant 0 : i32
    %7 = arith.cmpi ne, %6, %c0_i32_3 : i32
    scf.if %7 {
      %cst_14 = arith.constant 0.000000e+00 : f32
      %25 = vector.broadcast %cst_14 : f32 to vector<256x128xf32>
      %c0_15 = arith.constant 0 : index
      %c0_16 = arith.constant 0 : index
      %26 = vector.load %arg10[%c0_15, %c0_16] : memref<256x128xf32, #tpu.memory_space<vmem>>, vector<256x128xf32>
      tpu.vector_store %arg10[%c0_15, %c0_16], %25 {strides = array<i32>} : memref<256x128xf32, #tpu.memory_space<vmem>>, vector<256x128xf32>,
    } else {
    }
    %c512_i32 = arith.constant 512 : i32
    %8 = arith.muli %arg1, %c512_i32 : i32
    %9 = tpu.assume_multiple %8, 512 : i32
    %c0 = arith.constant 0 : index
    %c0_4 = arith.constant 0 : index
    %10 = vector.load %arg10[%c0, %c0_4] : memref<256x128xf32, #tpu.memory_space<vmem>>, vector<256x128xf32>
    %c0_5 = arith.constant 0 : index
    %c0_6 = arith.constant 0 : index
    %11 = vector.load %arg2[%c0_5, %c0_6] : memref<256x512xbf16, #tpu.memory_space<vmem>>, vector<256x512xbf16>
    %12 = arith.index_cast %9 : i32 to index
    %c0_7 = arith.constant 0 : index
    %13 = vector.load %arg3[%12, %c0_7] : memref<512x128xbf16, #tpu.memory_space<vmem>>, vector<512x128xbf16>
    %cst = arith.constant dense<0.000000e+00> : vector<256x128xf32>
    %14 = tpu.matmul %11, %13, %cst {dimension_numbers = #tpu.dot_dimension_numbers<[1], [0], [0], [1], [0, 0, 1, 1], [], []>} : vector<256x512xbf16>, vector<512x128xbf16>, vector<256x128xf32> -> vector<256x128xf32>
    %15 = arith.addf %10, %14 : vector<256x128xf32>
    %c0_8 = arith.constant 0 : index
    %c0_9 = arith.constant 0 : index
    %16 = vector.load %arg10[%c0_8, %c0_9] : memref<256x128xf32, #tpu.memory_space<vmem>>, vector<256x128xf32>
    tpu.vector_store %arg10[%c0_8, %c0_9], %15 {strides = array<i32>} : memref<256x128xf32, #tpu.memory_space<vmem>>, vector<256x128xf32>,
    %c0_i32_10 = arith.constant 0 : i32
    %17 = arith.cmpi eq, %arg1, %c0_i32_10 : i32
    %18 = arith.extui %17 : i1 to i32
    %c0_i32_11 = arith.constant 0 : i32
    %19 = arith.cmpi ne, %18, %c0_i32_11 : i32
    scf.if %19 {
      %c0_14 = arith.constant 0 : index
      %c0_15 = arith.constant 0 : index
      %25 = vector.load %arg10[%c0_14, %c0_15] : memref<256x128xf32, #tpu.memory_space<vmem>>, vector<256x128xf32>
      %c0_16 = arith.constant 0 : index
      %c0_17 = arith.constant 0 : index
      %26 = vector.load %arg4[%c0_16, %c0_17] : memref<1x128xf32, #tpu.memory_space<vmem>>, vector<1x128xf32>
      %27 = vector.broadcast %26 : vector<1x128xf32> to vector<256x128xf32>
      %28 = arith.addf %25, %27 : vector<256x128xf32>
      %cst_18 = arith.constant 0.000000e+00 : f32
      %29 = vector.broadcast %cst_18 : f32 to vector<256x128xf32>
      %30 = arith.maximumf %28, %29 : vector<256x128xf32>
      %c256_i32 = arith.constant 256 : i32
      %31 = arith.muli %arg0, %c256_i32 : i32
      %32 = tpu.iota {dimensions = array<i32: 0>} : vector<256x128xi32>
      %33 = vector.broadcast %31 : i32 to vector<256x128xi32>
      %34 = arith.addi %33, %32 : vector<256x128xi32>
      %c16_i32 = arith.constant 16 : i32
      %35 = vector.broadcast %c16_i32 : i32 to vector<256x128xi32>
      %36 = arith.cmpi slt, %34, %35 : vector<256x128xi32>
      %cst_19 = arith.constant 0.000000e+00 : f32
      %37 = vector.broadcast %cst_19 : f32 to vector<256x128xf32>
      %38 = arith.select %36, %30, %37 : vector<256x128xi1>, vector<256x128xf32>
      %c0_20 = arith.constant 0 : index
      %c0_21 = arith.constant 0 : index
      %39 = vector.load %arg11[%c0_20, %c0_21] : memref<8x128xf32, #tpu.memory_space<vmem>>, vector<8x128xf32>
      %c0_22 = arith.constant 0 : index
      %c0_23 = arith.constant 0 : index
      %40 = vector.load %arg5[%c0_22, %c0_23] : memref<8x256xbf16, #tpu.memory_space<vmem>>, vector<8x256xbf16>
      %41 = arith.truncf %38 : vector<256x128xf32> to vector<256x128xbf16>
      %cst_24 = arith.constant dense<0.000000e+00> : vector<8x128xf32>
      %42 = tpu.matmul %40, %41, %cst_24 {dimension_numbers = #tpu.dot_dimension_numbers<[1], [0], [0], [1], [0, 0, 1, 1], [], []>} : vector<8x256xbf16>, vector<256x128xbf16>, vector<8x128xf32> -> vector<8x128xf32>
      %43 = arith.addf %39, %42 : vector<8x128xf32>
      %c0_25 = arith.constant 0 : index
      %c0_26 = arith.constant 0 : index
      %44 = vector.load %arg11[%c0_25, %c0_26] : memref<8x128xf32, #tpu.memory_space<vmem>>, vector<8x128xf32>
      tpu.vector_store %arg11[%c0_25, %c0_26], %43 {strides = array<i32>} : memref<8x128xf32, #tpu.memory_space<vmem>>, vector<8x128xf32>,
    } else {
    }
    %c1_i32 = arith.constant 1 : i32
    %20 = arith.cmpi eq, %arg0, %c1_i32 : i32
    %c0_i32_12 = arith.constant 0 : i32
    %21 = arith.cmpi eq, %arg1, %c0_i32_12 : i32
    %22 = arith.andi %20, %21 : i1
    %23 = arith.extui %22 : i1 to i32
    %c0_i32_13 = arith.constant 0 : i32
    %24 = arith.cmpi ne, %23, %c0_i32_13 : i32
    scf.if %24 {
      %c0_14 = arith.constant 0 : index
      %c0_15 = arith.constant 0 : index
      %25 = vector.load %arg11[%c0_14, %c0_15] : memref<8x128xf32, #tpu.memory_space<vmem>>, vector<8x128xf32>
      %c0_16 = arith.constant 0 : index
      %c0_17 = arith.constant 0 : index
      %26 = vector.load %arg6[%c0_16, %c0_17] : memref<8x1xf32, #tpu.memory_space<vmem>>, vector<8x1xf32>
      %27 = vector.broadcast %26 : vector<8x1xf32> to vector<8x128xf32>
      %28 = arith.mulf %25, %27 : vector<8x128xf32>
      %29 = arith.truncf %28 : vector<8x128xf32> to vector<8x128xbf16>
      %c0_18 = arith.constant 0 : index
      %c0_19 = arith.constant 0 : index
      %30 = vector.load %arg7[%c0_18, %c0_19] : memref<128x128xbf16, #tpu.memory_space<vmem>>, vector<128x128xbf16>
      %cst_20 = arith.constant dense<0.000000e+00> : vector<8x128xf32>
      %31 = tpu.matmul %29, %30, %cst_20 {dimension_numbers = #tpu.dot_dimension_numbers<[1], [0], [0], [1], [0, 0, 1, 1], [], []>} : vector<8x128xbf16>, vector<128x128xbf16>, vector<8x128xf32> -> vector<8x128xf32>
      %c0_21 = arith.constant 0 : index
      %c0_22 = arith.constant 0 : index
      %32 = vector.load %arg8[%c0_21, %c0_22] : memref<1x128xf32, #tpu.memory_space<vmem>>, vector<1x128xf32>
      %33 = vector.broadcast %32 : vector<1x128xf32> to vector<8x128xf32>
      %34 = arith.addf %31, %33 : vector<8x128xf32>
      %c0_23 = arith.constant 0 : index
      %c0_24 = arith.constant 0 : index
      %35 = vector.load %arg9[%c0_23, %c0_24] : memref<8x128xf32, #tpu.memory_space<vmem>>, vector<8x128xf32>
      tpu.vector_store %arg9[%c0_23, %c0_24], %34 {strides = array<i32>} : memref<8x128xf32, #tpu.memory_space<vmem>>, vector<8x128xf32>,
    } else {
    }
    return
  }
  func.func @transform_0(%arg0: i32, %arg1: i32) -> (i32, i32) {
    %c0_i32 = arith.constant 0 : i32
    return %arg0, %arg1 : i32, i32
  }
  func.func @transform_1(%arg0: i32, %arg1: i32) -> (i32, i32) {
    %c0_i32 = arith.constant 0 : i32
    %c0_i32_0 = arith.constant 0 : i32
    %c0_i32_1 = arith.constant 0 : i32
    return %c0_i32, %c0_i32_0 : i32, i32
  }
  func.func @transform_2(%arg0: i32, %arg1: i32) -> (i32, i32) {
    %c0_i32 = arith.constant 0 : i32
    %c0_i32_0 = arith.constant 0 : i32
    %c0_i32_1 = arith.constant 0 : i32
    return %c0_i32, %c0_i32_0 : i32, i32
  }
  func.func @transform_3(%arg0: i32, %arg1: i32) -> (i32, i32) {
    %c0_i32 = arith.constant 0 : i32
    %c0_i32_0 = arith.constant 0 : i32
    return %c0_i32, %arg0 : i32, i32
  }
  func.func @transform_4(%arg0: i32, %arg1: i32) -> (i32, i32) {
    %c0_i32 = arith.constant 0 : i32
    %c0_i32_0 = arith.constant 0 : i32
    %c0_i32_1 = arith.constant 0 : i32
    return %c0_i32, %c0_i32_0 : i32, i32
  }
  func.func @transform_5(%arg0: i32, %arg1: i32) -> (i32, i32) {
    %c0_i32 = arith.constant 0 : i32
    %c0_i32_0 = arith.constant 0 : i32
    %c0_i32_1 = arith.constant 0 : i32
    return %c0_i32, %c0_i32_0 : i32, i32
  }
  func.func @transform_6(%arg0: i32, %arg1: i32) -> (i32, i32) {
    %c0_i32 = arith.constant 0 : i32
    %c0_i32_0 = arith.constant 0 : i32
    %c0_i32_1 = arith.constant 0 : i32
    return %c0_i32, %c0_i32_0 : i32, i32
  }
  func.func @transform_7(%arg0: i32, %arg1: i32) -> (i32, i32) {
    %c0_i32 = arith.constant 0 : i32
    %c0_i32_0 = arith.constant 0 : i32
    %c0_i32_1 = arith.constant 0 : i32
    return %c0_i32, %c0_i32_0 : i32, i32
  }
}

</mosaic_0001>

<bundles_post_ra>
// kernel: gcn_forward.4
= control target key start
LH: loop header
LB: loop body
LE: loop exit
PB: predicated region body
PF: predicated region fallthrough
CT: control target
= control target key end

     0   :  { %s1054_s9 = smov 0   ;;  %s1138_s0 = inlined_call_operand.vmem [shape: bf16[512,128], index: 0, kind: input, shape index: {}]   ;;  %s1139_s1 = inlined_call_operand.vmem [shape: bf16[128,128], index: 1, kind: input, shape index: {}]   ;;  %s1140_s2 = inlined_call_operand.vmem [shape: bf16[512,128], index: 2, kind: output, shape index: {}]  }
   0x1 LB: > { %s717_s10 = sadd.s32 4294967295, %s1037_s9   ;;  %p721_p0 = scmp.ge.s32.totalorder %s1037_s9, 1  ;;  %s1037_s9 = sphi %s1054_s9, %s12_s9  }
   0x2   : > { %p113_p1 = scmp.lt.s32.totalorder %s1037_s9, 3 }
   0x4   : > { %p114_p2 = pnand %p721_p0, %p113_p1 }
   0x5   : > { %v1007_v0 = vld [vmem:[%s1139_s1] sm:$0xff] (!%p114_p2)   ;;  %s722_s13 = sshll.u32 (!%p114_p2), %s717_s10, 5  ;;  %v1008_v1 = vld [vmem:[%s1139_s1 + $0x8] sm:$0xff] (!%p114_p2)   ;;  %v1009_v2 = vld [vmem:[%s1139_s1 + $0x10] sm:$0xff] (!%p114_p2)  }
   0x6   : > { %117 = sbr.rel (%p114_p2) target bundleno = 280 (0x118), region = 28  ;;  %p136_p3 = scmp.lt.s32.totalorder (!%p114_p2), %s722_s13, 63  ;;  %935 = vmatprep.subr.bf16.mxu0 (!%p114_p2), %v1007_v0  ;;  %983 = vmatprep.subr.bf16.mxu1 (!%p114_p2), %v1007_v0  ;;  %v1010_v3 = vld [vmem:[%s1139_s1 + $0x18] sm:$0xff] (!%p114_p2)   ;;  %v1011_v6 = vld [vmem:[%s1139_s1 + $0x20] sm:$0xff] (!%p114_p2)   ;;  %v1012_v7 = vld [vmem:[%s1139_s1 + $0x28] sm:$0xff] (!%p114_p2)  }
   0x7   : > { %936 = vmatpush3.bf16.msra.mxu0 (!%p114_p2), %v1007_v0  ;;  %991 = vmatpush3.bf16.msra.mxu1 (!%p114_p2), %v1007_v0  ;;  %v1013_v8 = vld [vmem:[%s1139_s1 + $0x30] sm:$0xff] (!%p114_p2)   ;;  %v1014_v9 = vld [vmem:[%s1139_s1 + $0x38] sm:$0xff] (!%p114_p2)  }
   0x8   : > { %937 = vmatprep.subr.bf16.mxu0 (!%p114_p2), %v1008_v1  ;;  %984 = vmatprep.subr.bf16.mxu1 (!%p114_p2), %v1008_v1 }
   0xb   : > { %938 = vmatpush3.bf16.msra.mxu0 (!%p114_p2), %v1008_v1  ;;  %992 = vmatpush3.bf16.msra.mxu1 (!%p114_p2), %v1008_v1 }
   0xc   : > { %939 = vmatprep.subr.bf16.mxu0 (!%p114_p2), %v1009_v2  ;;  %985 = vmatprep.subr.bf16.mxu1 (!%p114_p2), %v1009_v2 }
   0xd   : > { %s1142_s13 = smov (!%p136_p3, %s722_s13), 63 }
   0xe   : > { %s723_s18 = sshll.u32 %s1142_s13, 2 }
   0xf   : > { %s1079_s21 = scalar_lea.vmem %s1138_s0, %s723_s18  ;;  %940 = vmatpush3.bf16.msra.mxu0 %v1009_v2  ;;  %993 = vmatpush3.bf16.msra.mxu1 %v1009_v2  ;;  %s1117_s6 = scalar_lea.vmem %s1140_s2, %s723_s18 }
  0x10   : > { %v1015_v4 = vld [vmem:[%s1079_s21] sm:$0xff]   ;;  %941 = vmatprep.subr.bf16.mxu0 %v1010_v3  ;;  %986 = vmatprep.subr.bf16.mxu1 %v1010_v3  ;;  %v1017_v10 = vld [vmem:[%s1079_s21 + $0x8] sm:$0xff]   ;;  %v1019_v12 = vld [vmem:[%s1079_s21 + $0x10] sm:$0xff]  }
  0x11   : > { %v1016_v5 = vld [vmem:[%s1079_s21 + $0x40] sm:$0xff]   ;;  %951 = vmatprep.mubr.bf16.mxu0 %v1015_v4  ;;  %v1018_v11 = vld [vmem:[%s1079_s21 + $0x48] sm:$0xff]   ;;  %v1020_v13 = vld [vmem:[%s1079_s21 + $0x50] sm:$0xff]  }
  0x12   : > { %967 = vmatprep.mubr.bf16.mxu1 %v1016_v5  ;;  %v1021_v14 = vld [vmem:[%s1079_s21 + $0x18] sm:$0xff]   ;;  %v1023_v16 = vld [vmem:[%s1079_s21 + $0x20] sm:$0xff]   ;;  %v1025_v18 = vld [vmem:[%s1079_s21 + $0x28] sm:$0xff]  }
  0x13   : > { %942 = vmatpush3.bf16.msra.mxu0 %v1010_v3  ;;  %994 = vmatpush3.bf16.msra.mxu1 %v1010_v3  ;;  %v1022_v15 = vld [vmem:[%s1079_s21 + $0x58] sm:$0xff]   ;;  %v1024_v17 = vld [vmem:[%s1079_s21 + $0x60] sm:$0xff]   ;;  %v1026_v19 = vld [vmem:[%s1079_s21 + $0x68] sm:$0xff]  }
  0x14   : > { %943 = vmatprep.subr.bf16.mxu0 %v1011_v6  ;;  %987 = vmatprep.subr.bf16.mxu1 %v1011_v6  ;;  %v1027_v20 = vld [vmem:[%s1079_s21 + $0x30] sm:$0xff]   ;;  %v1029_v22 = vld [vmem:[%s1079_s21 + $0x38] sm:$0xff]  }
  0x15   : > { %v1028_v21 = vld [vmem:[%s1079_s21 + $0x70] sm:$0xff]   ;;  %v1030_v23 = vld [vmem:[%s1079_s21 + $0x78] sm:$0xff]  }
  0x17   : > { %944 = vmatpush3.bf16.msra.mxu0 %v1011_v6  ;;  %995 = vmatpush3.bf16.msra.mxu1 %v1011_v6 }
  0x18   : > { %945 = vmatprep.subr.bf16.mxu0 %v1012_v7  ;;  %988 = vmatprep.subr.bf16.mxu1 %v1012_v7 }
  0x1b   : > { %946 = vmatpush3.bf16.msra.mxu0 %v1012_v7  ;;  %996 = vmatpush3.bf16.msra.mxu1 %v1012_v7 }
  0x1c   : > { %947 = vmatprep.subr.bf16.mxu0 %v1013_v8  ;;  %989 = vmatprep.subr.bf16.mxu1 %v1013_v8 }
  0x1f   : > { %948 = vmatpush3.bf16.msra.mxu0 %v1013_v8  ;;  %997 = vmatpush3.bf16.msra.mxu1 %v1013_v8 }
  0x20   : > { %949 = vmatprep.subr.bf16.mxu0 %v1014_v9  ;;  %990 = vmatprep.subr.bf16.mxu1 %v1014_v9 }
  0x23   : > { %950 = vmatpush3.bf16.msra.mxu0 %v1014_v9  ;;  %998 = vmatpush3.bf16.msra.mxu1 %v1014_v9 }
  0x26   : > { %952 = vmatmul.mubr.bf16.vlgmr.msra.gmra.mrb[0].mxu0 %v1017_v10  ;;  %968 = vmatmul.mubr.bf16.vlgmr.msra.gmra.mrb[0].mxu1 %v1018_v11 }
  0x27   : > { %955 = vmatprep.mubr.bf16.mxu0 %v1019_v12  ;;  %971 = vmatprep.mubr.bf16.mxu1 %v1020_v13 }
  0x2e   : > { %956 = vmatmul.mubr.bf16.gmra.mrb[4].mxu0 %v1021_v14  ;;  %972 = vmatmul.mubr.bf16.gmra.mrb[4].mxu1 %v1022_v15 }
  0x2f   : > { %959 = vmatprep.mubr.bf16.mxu0 %v1023_v16  ;;  %975 = vmatprep.mubr.bf16.mxu1 %v1024_v17 }
  0x36   : > { %960 = vmatmul.mubr.bf16.gmra.mrb[8].mxu0 %v1025_v18  ;;  %976 = vmatmul.mubr.bf16.gmra.mrb[8].mxu1 %v1026_v19 }
  0x37   : > { %963 = vmatprep.mubr.bf16.mxu0 %v1027_v20  ;;  %979 = vmatprep.mubr.bf16.mxu1 %v1028_v21 }
  0x3e   : > { %964 = vmatmul.mubr.bf16.gmra.mrb[12].mxu0 %v1029_v22  ;;  %980 = vmatmul.mubr.bf16.gmra.mrb[12].mxu1 %v1030_v23 }
  0xf9   : > { %v953_v24 = vpop.f32.mrb[0].mxu0  ;;  %v969_v25 = vpop.f32.mrb[0].mxu1 }
  0xfa   : > { %v374_v26 = vpop.f32.mrb[1].mxu0  ;;  %v438_v27 = vpop.f32.mrb[1].mxu1 }
  0xfb   : > { %v954_v28 = vpop.f32.mrb[2].mxu0  ;;  %v970_v29 = vpop.f32.mrb[2].mxu1 }
  0xfc   : > { %v824_v30 = vpack.c.bf16 %v954_v28, %v953_v24  ;;  %v864_v31 = vpack.c.bf16 %v970_v29, %v969_v25  ;;  %v377_v32 = vpop.f32.mrb[3].mxu0  ;;  %v441_v33 = vpop.f32.mrb[3].mxu1 }
  0xfd   : > { %v819_v34 = vpack.c.bf16 %v377_v32, %v374_v26  ;;  %v859_v35 = vpack.c.bf16 %v441_v33, %v438_v27 }
  0xfe   : > { %896 = vst [vmem:[%s1117_s6 + $0x8] sm:$0xff] %v824_v30   ;;  %904 = vst [vmem:[%s1117_s6 + $0x48] sm:$0xff] %v864_v31  }
  0xff   : > { %820 = vst [vmem:[%s1117_s6] sm:$0xff] %v819_v34   ;;  %903 = vst [vmem:[%s1117_s6 + $0x40] sm:$0xff] %v859_v35  }
 0x101   : > { %v957_v36 = vpop.f32.mrb[4].mxu0  ;;  %v973_v37 = vpop.f32.mrb[4].mxu1 }
 0x102   : > { %v390_v38 = vpop.f32.mrb[5].mxu0  ;;  %v454_v39 = vpop.f32.mrb[5].mxu1 }
 0x103   : > { %v958_v40 = vpop.f32.mrb[6].mxu0  ;;  %v974_v41 = vpop.f32.mrb[6].mxu1 }
 0x104   : > { %v834_v42 = vpack.c.bf16 %v958_v40, %v957_v36  ;;  %v874_v43 = vpack.c.bf16 %v974_v41, %v973_v37  ;;  %v393_v44 = vpop.f32.mrb[7].mxu0  ;;  %v457_v45 = vpop.f32.mrb[7].mxu1 }
 0x105   : > { %v829_v46 = vpack.c.bf16 %v393_v44, %v390_v38  ;;  %v869_v47 = vpack.c.bf16 %v457_v45, %v454_v39 }
 0x106   : > { %898 = vst [vmem:[%s1117_s6 + $0x18] sm:$0xff] %v834_v42   ;;  %906 = vst [vmem:[%s1117_s6 + $0x58] sm:$0xff] %v874_v43  }
 0x107   : > { %897 = vst [vmem:[%s1117_s6 + $0x10] sm:$0xff] %v829_v46   ;;  %905 = vst [vmem:[%s1117_s6 + $0x50] sm:$0xff] %v869_v47  }
 0x109   : > { %v961_v48 = vpop.f32.mrb[8].mxu0  ;;  %v977_v49 = vpop.f32.mrb[8].mxu1 }
 0x10a   : > { %v406_v50 = vpop.f32.mrb[9].mxu0  ;;  %v470_v51 = vpop.f32.mrb[9].mxu1 }
 0x10b   : > { %v962_v52 = vpop.f32.mrb[10].mxu0  ;;  %v978_v53 = vpop.f32.mrb[10].mxu1 }
 0x10c   : > { %v844_v54 = vpack.c.bf16 %v962_v52, %v961_v48  ;;  %v884_v55 = vpack.c.bf16 %v978_v53, %v977_v49  ;;  %v409_v56 = vpop.f32.mrb[11].mxu0  ;;  %v473_v57 = vpop.f32.mrb[11].mxu1 }
 0x10d   : > { %v839_v58 = vpack.c.bf16 %v409_v56, %v406_v50  ;;  %v879_v59 = vpack.c.bf16 %v473_v57, %v470_v51 }
 0x10e   : > { %900 = vst [vmem:[%s1117_s6 + $0x28] sm:$0xff] %v844_v54   ;;  %908 = vst [vmem:[%s1117_s6 + $0x68] sm:$0xff] %v884_v55  }
 0x10f   : > { %899 = vst [vmem:[%s1117_s6 + $0x20] sm:$0xff] %v839_v58   ;;  %907 = vst [vmem:[%s1117_s6 + $0x60] sm:$0xff] %v879_v59  }
 0x111   : > { %v965_v60 = vpop.f32.mrb[12].mxu0  ;;  %v981_v61 = vpop.f32.mrb[12].mxu1 }
 0x112   : > { %v422_v62 = vpop.f32.mrb[13].mxu0  ;;  %v486_v63 = vpop.f32.mrb[13].mxu1 }
 0x113   : > { %v966_v0 = vpop.f32.mrb[14].mxu0  ;;  %v982_v1 = vpop.f32.mrb[14].mxu1 }
 0x114   : > { %v854_v2 = vpack.c.bf16 %v966_v0, %v965_v60  ;;  %v894_v3 = vpack.c.bf16 %v982_v1, %v981_v61  ;;  %v425_v4 = vpop.f32.mrb[15].mxu0  ;;  %v489_v5 = vpop.f32.mrb[15].mxu1 }
 0x115   : > { %v849_v6 = vpack.c.bf16 %v425_v4, %v422_v62  ;;  %v889_v7 = vpack.c.bf16 %v489_v5, %v486_v63 }
 0x116   : > { %902 = vst [vmem:[%s1117_s6 + $0x38] sm:$0xff] %v854_v2   ;;  %910 = vst [vmem:[%s1117_s6 + $0x78] sm:$0xff] %v894_v3  }
 0x117   : > { %901 = vst [vmem:[%s1117_s6 + $0x30] sm:$0xff] %v849_v6   ;;  %909 = vst [vmem:[%s1117_s6 + $0x70] sm:$0xff] %v889_v7  }
 0x118 PF: > { %s12_s9 = sadd.s32 1, %s1037_s9  }
 0x119   : > { %p9_p4 = scmp.ge.s32.totalorder %s12_s9, 4  }
 0x11b   :  { %11 = sbr.rel (!%p9_p4) target bundleno = 1 (0x1), region = 58 }

// kernel: gcn_forward.5
= control target key start
LH: loop header
LB: loop body
LE: loop exit
PB: predicated region body
PF: predicated region fallthrough
CT: control target
= control target key end

     0   :  { %s2465_s12 = smov 0   ;;  %s2467_s13 = smov 0   ;;  %s2799_s0 = inlined_call_operand.vmem [shape: bf16[512,512], index: 0, kind: input, shape index: {}]   ;;  %s2800_s1 = inlined_call_operand.vmem [shape: bf16[512,128], index: 1, kind: input, shape index: {}]   ;;  %s2801_s2 = inlined_call_operand.vmem [shape: f32[1,128], index: 2, kind: input, shape index: {}]   ;;  %s2802_s3 = inlined_call_operand.vmem [shape: bf16[512,128], index: 3, kind: output, shape index: {}]  }
   0x1   :  { %s2469_s14 = smov 0  }
   0x2 LB: > { %s25_s15 = sadd.s32 1, %s2439_s13  ;;  %p1779_p0 = scmp.ge.s32.totalorder %s2443_s14, 1  ;;  %s2443_s14 = sphi %s2469_s14, %s13_s14   ;;  %s2439_s13 = sphi %s2467_s13, %s2804_s13   ;;  %s2435_s12 = sphi %s2465_s12, %s2803_s12  }
   0x3   : > { %p27_p1 = scmp.ge.s32.totalorder %s25_s15, 2  ;;  %p158_p2 = scmp.lt.s32.totalorder %s2443_s14, 3 }
   0x5   : > { %s2806_s15 = smov (%p27_p1, %s25_s15), 0  ;;  %p159_p3 = pnand %p1779_p0, %p158_p2 }
   0x6   : > { %v2293_v0 = vld [vmem:[%s2800_s1 + $0x40] sm:$0xff] (!%p159_p3)   ;;  %v2297_v4 = vld [vmem:[%s2800_s1 + $0x48] sm:$0xff] (!%p159_p3)   ;;  %v2301_v8 = vld [vmem:[%s2800_s1 + $0x50] sm:$0xff] (!%p159_p3)   ;;  %s1780_s25 = sshll.u32 (!%p159_p3), %s2435_s12, 5  ;;  %s1882_s17 = sshll.u32 (!%p159_p3), %s2435_s12, 8 }
   0x7   : > { %162 = sbr.rel (%p159_p3) target bundleno = 388 (0x184), region = 32  ;;  %v2294_v1 = vld [vmem:[%s2800_s1 + $0xc0] sm:$0xff] (!%p159_p3)   ;;  %2045 = vmatprep.subr.bf16.mxu0 (!%p159_p3), %v2293_v0  ;;  %v2298_v5 = vld [vmem:[%s2800_s1 + $0xc8] sm:$0xff] (!%p159_p3)   ;;  %v2302_v9 = vld [vmem:[%s2800_s1 + $0xd0] sm:$0xff] (!%p159_p3)   ;;  %p189_p4 = scmp.lt.s32.totalorder (!%p159_p3), %s1780_s25, 63 }
   0x8   : > { %v2295_v2 = vld [vmem:[%s2800_s1] sm:$0xff] (!%p159_p3)   ;;  %2157 = vmatprep.subr.bf16.mxu1 (!%p159_p3), %v2294_v1  ;;  %v2299_v6 = vld [vmem:[%s2800_s1 + $0x8] sm:$0xff] (!%p159_p3)   ;;  %v2303_v10 = vld [vmem:[%s2800_s1 + $0x10] sm:$0xff] (!%p159_p3)  }
   0x9   : > { %v2296_v3 = vld [vmem:[%s2800_s1 + $0x80] sm:$0xff] (!%p159_p3)   ;;  %2046 = vmatpush3.bf16.msra.mxu0 (!%p159_p3), %v2295_v2  ;;  %v2300_v7 = vld [vmem:[%s2800_s1 + $0x88] sm:$0xff] (!%p159_p3)   ;;  %v2304_v11 = vld [vmem:[%s2800_s1 + $0x90] sm:$0xff] (!%p159_p3)  }
   0xa   : > { %2158 = vmatpush3.bf16.msra.mxu1 (!%p159_p3), %v2296_v3  ;;  %2047 = vmatprep.subr.bf16.mxu0 (!%p159_p3), %v2297_v4  ;;  %v2305_v12 = vld [vmem:[%s2800_s1 + $0x58] sm:$0xff] (!%p159_p3)   ;;  %v2309_v16 = vld [vmem:[%s2800_s1 + $0x60] sm:$0xff] (!%p159_p3)   ;;  %v2313_v20 = vld [vmem:[%s2800_s1 + $0x68] sm:$0xff] (!%p159_p3)  }
   0xb   : > { %2159 = vmatprep.subr.bf16.mxu1 (!%p159_p3), %v2298_v5  ;;  %v2306_v13 = vld [vmem:[%s2800_s1 + $0xd8] sm:$0xff] (!%p159_p3)   ;;  %v2310_v17 = vld [vmem:[%s2800_s1 + $0xe0] sm:$0xff] (!%p159_p3)   ;;  %v2314_v21 = vld [vmem:[%s2800_s1 + $0xe8] sm:$0xff] (!%p159_p3)  }
   0xc   : > { %v2307_v14 = vld [vmem:[%s2800_s1 + $0x18] sm:$0xff] (!%p159_p3)   ;;  %v2311_v18 = vld [vmem:[%s2800_s1 + $0x20] sm:$0xff] (!%p159_p3)   ;;  %v2315_v22 = vld [vmem:[%s2800_s1 + $0x28] sm:$0xff] (!%p159_p3)  }
   0xd   : > { %2048 = vmatpush3.bf16.msra.mxu0 (!%p159_p3), %v2299_v6  ;;  %v2308_v15 = vld [vmem:[%s2800_s1 + $0x98] sm:$0xff] (!%p159_p3)   ;;  %v2312_v19 = vld [vmem:[%s2800_s1 + $0xa0] sm:$0xff] (!%p159_p3)   ;;  %v2316_v23 = vld [vmem:[%s2800_s1 + $0xa8] sm:$0xff] (!%p159_p3)  }
   0xe   : > { %2160 = vmatpush3.bf16.msra.mxu1 %v2300_v7  ;;  %2049 = vmatprep.subr.bf16.mxu0 %v2301_v8  ;;  %s2808_s25 = smov (!%p189_p4, %s1780_s25), 63  ;;  %v2317_v24 = vld [vmem:[%s2800_s1 + $0x70] sm:$0xff]   ;;  %v2321_v28 = vld [vmem:[%s2800_s1 + $0x78] sm:$0xff]  }
   0xf   : > { %2161 = vmatprep.subr.bf16.mxu1 %v2302_v9  ;;  %v2318_v25 = vld [vmem:[%s2800_s1 + $0xf0] sm:$0xff]   ;;  %s1917_s26 = sshll.u32 %s2808_s25, 4  ;;  %v2322_v29 = vld [vmem:[%s2800_s1 + $0xf8] sm:$0xff]   ;;  %s1784_s12 = sshll.u32 %s2808_s25, 2 }
  0x10   : > { %v2319_v26 = vld [vmem:[%s2800_s1 + $0x30] sm:$0xff]   ;;  %s2582_s8 = scalar_lea.vmem %s2799_s0, %s1917_s26  ;;  %v2323_v30 = vld [vmem:[%s2800_s1 + $0x38] sm:$0xff]   ;;  %s2677_s25 = scalar_lea.vmem %s2802_s3, %s1784_s12 }
  0x11   : > { %2050 = vmatpush3.bf16.msra.mxu0 %v2303_v10  ;;  %v2320_v27 = vld [vmem:[%s2800_s1 + $0xb0] sm:$0xff]   ;;  %v2324_v31 = vld [vmem:[%s2800_s1 + $0xb8] sm:$0xff]  }
  0x12   : > { %2162 = vmatpush3.bf16.msra.mxu1 %v2304_v11  ;;  %2051 = vmatprep.subr.bf16.mxu0 %v2305_v12  ;;  %v2325_v32 = vld [vmem:[%s2582_s8] ss:$16 sps:$4 sm:$0xff]   ;;  %v2327_v33 = vld [vmem:[%s2582_s8 + $0x4] ss:$16 sps:$4 sm:$0xff]   ;;  %v2328_v34 = vld [vmem:[%s2582_s8 + $0x8] ss:$16 sps:$4 sm:$0xff]  }
  0x13   : > { %2163 = vmatprep.subr.bf16.mxu1 %v2306_v13  ;;  %v2330_v35 = vld [vmem:[%s2582_s8 + $0xc] ss:$16 sps:$4 sm:$0xff]   ;;  %951 = vmatprep.mubr.bf16.mxu0 %v2327_v33  ;;  %v2331_v36 = vld [vmem:[%s2582_s8 + $0x24] ss:$16 sps:$4 sm:$0xff]   ;;  %v2335_v38 = vld [vmem:[%s2582_s8 + $0x20] ss:$16 sps:$4 sm:$0xff]  }
  0x14   : > { %1112 = vmatprep.mubr.bf16.mxu1 %v2330_v35  ;;  %v2333_v37 = vld [vmem:[%s2582_s8 + $0x2c] ss:$16 sps:$4 sm:$0xff]   ;;  %v2336_v39 = vld [vmem:[%s2582_s8 + $0x28] ss:$16 sps:$4 sm:$0xff]   ;;  %v2337_v40 = vld [vmem:[%s2582_s8 + $0x44] ss:$16 sps:$4 sm:$0xff]  }
  0x15   : > { %2052 = vmatpush3.bf16.msra.mxu0 %v2307_v14  ;;  %v2339_v41 = vld [vmem:[%s2582_s8 + $0x4c] ss:$16 sps:$4 sm:$0xff]   ;;  %v2341_v42 = vld [vmem:[%s2582_s8 + $0x40] ss:$16 sps:$4 sm:$0xff]   ;;  %v2342_v43 = vld [vmem:[%s2582_s8 + $0x48] ss:$16 sps:$4 sm:$0xff]  }
  0x16   : > { %2164 = vmatpush3.bf16.msra.mxu1 %v2308_v15  ;;  %2053 = vmatprep.subr.bf16.mxu0 %v2309_v16  ;;  %v2343_v44 = vld [vmem:[%s2582_s8 + $0x64] ss:$16 sps:$4 sm:$0xff]   ;;  %v2345_v45 = vld [vmem:[%s2582_s8 + $0x6c] ss:$16 sps:$4 sm:$0xff]   ;;  %v2347_v46 = vld [vmem:[%s2582_s8 + $0x60] ss:$16 sps:$4 sm:$0xff]  }
  0x17   : > { %2165 = vmatprep.subr.bf16.mxu1 %v2310_v17  ;;  %v2348_v47 = vld [vmem:[%s2582_s8 + $0x68] ss:$16 sps:$4 sm:$0xff]   ;;  %v2349_v48 = vld [vmem:[%s2582_s8 + $0x84] ss:$16 sps:$4 sm:$0xff]   ;;  %v2351_v49 = vld [vmem:[%s2582_s8 + $0x8c] ss:$16 sps:$4 sm:$0xff]  }
  0x18   : > { %v2353_v50 = vld [vmem:[%s2582_s8 + $0x80] ss:$16 sps:$4 sm:$0xff]   ;;  %v2354_v51 = vld [vmem:[%s2582_s8 + $0x88] ss:$16 sps:$4 sm:$0xff]   ;;  %v2355_v52 = vld [vmem:[%s2582_s8 + $0xa4] ss:$16 sps:$4 sm:$0xff]  }
  0x19   : > { %2054 = vmatpush3.bf16.msra.mxu0 %v2311_v18  ;;  %v2357_v53 = vld [vmem:[%s2582_s8 + $0xac] ss:$16 sps:$4 sm:$0xff]   ;;  %v2359_v54 = vld [vmem:[%s2582_s8 + $0xa0] ss:$16 sps:$4 sm:$0xff]   ;;  %v2360_v55 = vld [vmem:[%s2582_s8 + $0xa8] ss:$16 sps:$4 sm:$0xff]  }
  0x1a   : > { %2166 = vmatpush3.bf16.msra.mxu1 %v2312_v19  ;;  %2055 = vmatprep.subr.bf16.mxu0 %v2313_v20  ;;  %v2361_v56 = vld [vmem:[%s2582_s8 + $0xc4] ss:$16 sps:$4 sm:$0xff]   ;;  %v2363_v57 = vld [vmem:[%s2582_s8 + $0xcc] ss:$16 sps:$4 sm:$0xff]   ;;  %v2365_v58 = vld [vmem:[%s2582_s8 + $0xc0] ss:$16 sps:$4 sm:$0xff]  }
  0x1b   : > { %2167 = vmatprep.subr.bf16.mxu1 %v2314_v21  ;;  %v2366_v59 = vld [vmem:[%s2582_s8 + $0xc8] ss:$16 sps:$4 sm:$0xff]   ;;  %v2367_v60 = vld [vmem:[%s2582_s8 + $0xe4] ss:$16 sps:$4 sm:$0xff]   ;;  %v2369_v61 = vld [vmem:[%s2582_s8 + $0xec] ss:$16 sps:$4 sm:$0xff]  }
  0x1c   : > { %v2371_v62 = vld [vmem:[%s2582_s8 + $0xe0] ss:$16 sps:$4 sm:$0xff]   ;;  %v2372_v63 = vld [vmem:[%s2582_s8 + $0xe8] ss:$16 sps:$4 sm:$0xff]   ;;  %v2373_v0 = vld [vmem:[%s2582_s8 + $0x104] ss:$16 sps:$4 sm:$0xff]  }
  0x1d   : > { %2056 = vmatpush3.bf16.msra.mxu0 %v2315_v22  ;;  %v2375_v1 = vld [vmem:[%s2582_s8 + $0x10c] ss:$16 sps:$4 sm:$0xff]   ;;  %v2377_v2 = vld [vmem:[%s2582_s8 + $0x100] ss:$16 sps:$4 sm:$0xff]   ;;  %v2378_v3 = vld [vmem:[%s2582_s8 + $0x108] ss:$16 sps:$4 sm:$0xff]  }
  0x1e   : > { %2168 = vmatpush3.bf16.msra.mxu1 %v2316_v23  ;;  %2057 = vmatprep.subr.bf16.mxu0 %v2317_v24  ;;  %v2379_v4 = vld [vmem:[%s2582_s8 + $0x124] ss:$16 sps:$4 sm:$0xff]   ;;  %v2381_v5 = vld [vmem:[%s2582_s8 + $0x12c] ss:$16 sps:$4 sm:$0xff]   ;;  %v2383_v6 = vld [vmem:[%s2582_s8 + $0x120] ss:$16 sps:$4 sm:$0xff]  }
  0x1f   : > { %2169 = vmatprep.subr.bf16.mxu1 %v2318_v25  ;;  %v2384_v7 = vld [vmem:[%s2582_s8 + $0x128] ss:$16 sps:$4 sm:$0xff]   ;;  %v2385_v8 = vld [vmem:[%s2582_s8 + $0x144] ss:$16 sps:$4 sm:$0xff]   ;;  %v2387_v9 = vld [vmem:[%s2582_s8 + $0x14c] ss:$16 sps:$4 sm:$0xff]  }
  0x20   : > { %v2389_v10 = vld [vmem:[%s2582_s8 + $0x140] ss:$16 sps:$4 sm:$0xff]   ;;  %v2390_v11 = vld [vmem:[%s2582_s8 + $0x148] ss:$16 sps:$4 sm:$0xff]   ;;  %v2391_v12 = vld [vmem:[%s2582_s8 + $0x164] ss:$16 sps:$4 sm:$0xff]  }
  0x21   : > { %2058 = vmatpush3.bf16.msra.mxu0 %v2319_v26  ;;  %v2393_v13 = vld [vmem:[%s2582_s8 + $0x16c] ss:$16 sps:$4 sm:$0xff]   ;;  %v2395_v14 = vld [vmem:[%s2582_s8 + $0x160] ss:$16 sps:$4 sm:$0xff]   ;;  %v2396_v15 = vld [vmem:[%s2582_s8 + $0x168] ss:$16 sps:$4 sm:$0xff]  }
  0x22   : > { %2170 = vmatpush3.bf16.msra.mxu1 %v2320_v27  ;;  %2059 = vmatprep.subr.bf16.mxu0 %v2321_v28  ;;  %v2397_v16 = vld [vmem:[%s2582_s8 + $0x184] ss:$16 sps:$4 sm:$0xff]   ;;  %v2399_v17 = vld [vmem:[%s2582_s8 + $0x18c] ss:$16 sps:$4 sm:$0xff]   ;;  %v2401_v18 = vld [vmem:[%s2582_s8 + $0x180] ss:$16 sps:$4 sm:$0xff]  }
  0x23   : > { %2171 = vmatprep.subr.bf16.mxu1 %v2322_v29  ;;  %v2402_v19 = vld [vmem:[%s2582_s8 + $0x188] ss:$16 sps:$4 sm:$0xff]   ;;  %v2403_v20 = vld [vmem:[%s2582_s8 + $0x1a4] ss:$16 sps:$4 sm:$0xff]   ;;  %v2405_v21 = vld [vmem:[%s2582_s8 + $0x1ac] ss:$16 sps:$4 sm:$0xff]  }
  0x24   : > { %v2407_v22 = vld [vmem:[%s2582_s8 + $0x1a0] ss:$16 sps:$4 sm:$0xff]   ;;  %v2408_v23 = vld [vmem:[%s2582_s8 + $0x1a8] ss:$16 sps:$4 sm:$0xff]   ;;  %v2409_v24 = vld [vmem:[%s2582_s8 + $0x1c4] ss:$16 sps:$4 sm:$0xff]  }
  0x25   : > { %2060 = vmatpush3.bf16.msra.mxu0 %v2323_v30  ;;  %v2411_v25 = vld [vmem:[%s2582_s8 + $0x1cc] ss:$16 sps:$4 sm:$0xff]   ;;  %v2413_v26 = vld [vmem:[%s2582_s8 + $0x1c0] ss:$16 sps:$4 sm:$0xff]   ;;  %v2414_v27 = vld [vmem:[%s2582_s8 + $0x1c8] ss:$16 sps:$4 sm:$0xff]  }
  0x26   : > { %2172 = vmatpush3.bf16.msra.mxu1 %v2324_v31  ;;  %v2415_v28 = vld [vmem:[%s2582_s8 + $0x1e4] ss:$16 sps:$4 sm:$0xff]   ;;  %v2417_v29 = vld [vmem:[%s2582_s8 + $0x1ec] ss:$16 sps:$4 sm:$0xff]   ;;  %v2419_v30 = vld [vmem:[%s2582_s8 + $0x1e0] ss:$16 sps:$4 sm:$0xff]  }
  0x27   : > { %v2420_v31 = vld [vmem:[%s2582_s8 + $0x1e8] ss:$16 sps:$4 sm:$0xff]  }
  0x28   : > { %952 = vmatmul.mubr.bf16.vlgmr.msra.gmra.mrb[0].mxu0 %v2325_v32  ;;  %v1412_v32 = vlaneseq }
  0x29   : > { %1113 = vmatmul.mubr.bf16.vlgmr.msra.gmra.mrb[0].mxu1 %v2328_v34  ;;  %959 = vmatprep.mubr.bf16.mxu0 %v2331_v36 }
  0x2a   : > { %1120 = vmatprep.mubr.bf16.mxu1 %v2333_v37  ;;  %v2654_v33 = vshrl.u32 %v1412_v32, 7 }
  0x30   : > { %960 = vmatmul.mubr.bf16.gmra.mrb[4].mxu0 %v2335_v38 }
  0x31   : > { %1121 = vmatmul.mubr.bf16.gmra.mrb[4].mxu1 %v2336_v39  ;;  %967 = vmatprep.mubr.bf16.mxu0 %v2337_v40  ;;  %v2657_v39 = vstv %s1882_s17 }
  0x32   : > { %1128 = vmatprep.mubr.bf16.mxu1 %v2339_v41  ;;  %v1414_v41 = vadd.s32 8, %v2654_v33 }
  0x38   : > { %968 = vmatmul.mubr.bf16.gmra.mrb[8].mxu0 %v2341_v42 }
  0x39   : > { %1129 = vmatmul.mubr.bf16.gmra.mrb[8].mxu1 %v2342_v43  ;;  %975 = vmatprep.mubr.bf16.mxu0 %v2343_v44 }
  0x3a   : > { %1136 = vmatprep.mubr.bf16.mxu1 %v2345_v45  ;;  %v2663_v45 = vld [vmem:[%s2801_s2] ss:$0 sm:$0xff] }
  0x40   : > { %976 = vmatmul.mubr.bf16.gmra.mrb[12].mxu0 %v2347_v46 }
  0x41   : > { %1137 = vmatmul.mubr.bf16.gmra.mrb[12].mxu1 %v2348_v47  ;;  %983 = vmatprep.mubr.bf16.mxu0 %v2349_v48 }
  0x42   : > { %1144 = vmatprep.mubr.bf16.mxu1 %v2351_v49  ;;  %v1446_v49 = vadd.s32 %v2657_v39, %v2654_v33 }
  0x44   : > { %vm1478_vm0 = vcmp.lt.s32.totalorder %v1446_v49, 16 }
  0x48   : > { %984 = vmatmul.mubr.bf16.gmra.mrb[16].mxu0 %v2353_v50 }
  0x49   : > { %1145 = vmatmul.mubr.bf16.gmra.mrb[16].mxu1 %v2354_v51  ;;  %991 = vmatprep.mubr.bf16.mxu0 %v2355_v52  ;;  %v1447_v51 = vadd.s32 %v2657_v39, %v1414_v41 }
  0x4a   : > { %1152 = vmatprep.mubr.bf16.mxu1 %v2357_v53 }
  0x4b   : > { %vm1479_vm1 = vcmp.lt.s32.totalorder %v1447_v51, 16 }
  0x50   : > { %992 = vmatmul.mubr.bf16.gmra.mrb[20].mxu0 %v2359_v54 }
  0x51   : > { %1153 = vmatmul.mubr.bf16.gmra.mrb[20].mxu1 %v2360_v55  ;;  %999 = vmatprep.mubr.bf16.mxu0 %v2361_v56 }
  0x52   : > { %1160 = vmatprep.mubr.bf16.mxu1 %v2363_v57 }
  0x58   : > { %1000 = vmatmul.mubr.bf16.gmra.mrb[24].mxu0 %v2365_v58 }
  0x59   : > { %1161 = vmatmul.mubr.bf16.gmra.mrb[24].mxu1 %v2366_v59  ;;  %1007 = vmatprep.mubr.bf16.mxu0 %v2367_v60 }
  0x5a   : > { %1168 = vmatprep.mubr.bf16.mxu1 %v2369_v61  ;;  %v1415_v61 = vadd.s32 16, %v2654_v33 }
  0x60   : > { %1008 = vmatmul.mubr.bf16.gmra.mrb[28].mxu0 %v2371_v62 }
  0x61   : > { %1169 = vmatmul.mubr.bf16.gmra.mrb[28].mxu1 %v2372_v63  ;;  %1015 = vmatprep.mubr.bf16.mxu0 %v2373_v0  ;;  %v1416_v63 = vadd.s32 24, %v2654_v33 }
  0x62   : > { %1176 = vmatprep.mubr.bf16.mxu1 %v2375_v1 }
  0x68   : > { %1016 = vmatmul.mubr.bf16.gmra.mrb[32].mxu0 %v2377_v2 }
  0x69   : > { %1177 = vmatmul.mubr.bf16.gmra.mrb[32].mxu1 %v2378_v3  ;;  %1023 = vmatprep.mubr.bf16.mxu0 %v2379_v4 }
  0x6a   : > { %1184 = vmatprep.mubr.bf16.mxu1 %v2381_v5 }
  0x70   : > { %1024 = vmatmul.mubr.bf16.gmra.mrb[36].mxu0 %v2383_v6 }
  0x71   : > { %1185 = vmatmul.mubr.bf16.gmra.mrb[36].mxu1 %v2384_v7  ;;  %1031 = vmatprep.mubr.bf16.mxu0 %v2385_v8 }
  0x72   : > { %1192 = vmatprep.mubr.bf16.mxu1 %v2387_v9 }
  0x78   : > { %1032 = vmatmul.mubr.bf16.gmra.mrb[40].mxu0 %v2389_v10 }
  0x79   : > { %1193 = vmatmul.mubr.bf16.gmra.mrb[40].mxu1 %v2390_v11  ;;  %1039 = vmatprep.mubr.bf16.mxu0 %v2391_v12  ;;  %v1448_v11 = vadd.s32 %v2657_v39, %v1415_v61  ;;  %v1449_v12 = vadd.s32 %v2657_v39, %v1416_v63 }
  0x7a   : > { %1200 = vmatprep.mubr.bf16.mxu1 %v2393_v13 }
  0x7b   : > { %vm1480_vm2 = vcmp.lt.s32.totalorder %v1448_v11, 16  ;;  %vm1481_vm3 = vcmp.lt.s32.totalorder %v1449_v12, 16 }
  0x80   : > { %1040 = vmatmul.mubr.bf16.gmra.mrb[44].mxu0 %v2395_v14 }
  0x81   : > { %1201 = vmatmul.mubr.bf16.gmra.mrb[44].mxu1 %v2396_v15  ;;  %1047 = vmatprep.mubr.bf16.mxu0 %v2397_v16  ;;  %v1417_v16 = vadd.s32 32, %v2654_v33 }
  0x82   : > { %1208 = vmatprep.mubr.bf16.mxu1 %v2399_v17 }
  0x88   : > { %1048 = vmatmul.mubr.bf16.gmra.mrb[48].mxu0 %v2401_v18 }
  0x89   : > { %1209 = vmatmul.mubr.bf16.gmra.mrb[48].mxu1 %v2402_v19  ;;  %1055 = vmatprep.mubr.bf16.mxu0 %v2403_v20 }
  0x8a   : > { %1216 = vmatprep.mubr.bf16.mxu1 %v2405_v21 }
  0x90   : > { %1056 = vmatmul.mubr.bf16.gmra.mrb[52].mxu0 %v2407_v22 }
  0x91   : > { %1217 = vmatmul.mubr.bf16.gmra.mrb[52].mxu1 %v2408_v23  ;;  %1063 = vmatprep.mubr.bf16.mxu0 %v2409_v24  ;;  %v1418_v24 = vadd.s32 40, %v2654_v33 }
  0x92   : > { %1224 = vmatprep.mubr.bf16.mxu1 %v2411_v25 }
  0x98   : > { %1064 = vmatmul.mubr.bf16.gmra.mrb[56].mxu0 %v2413_v26 }
  0x99   : > { %1225 = vmatmul.mubr.bf16.gmra.mrb[56].mxu1 %v2414_v27  ;;  %1071 = vmatprep.mubr.bf16.mxu0 %v2415_v28 }
  0x9a   : > { %1232 = vmatprep.mubr.bf16.mxu1 %v2417_v29  ;;  %v1450_v29 = vadd.s32 %v2657_v39, %v1417_v16 }
  0x9c   : > { %vm1482_vm4 = vcmp.lt.s32.totalorder %v1450_v29, 16 }
  0xa0   : > { %1072 = vmatmul.mubr.bf16.gmra.mrb[60].mxu0 %v2419_v30 }
  0xa1   : > { %1233 = vmatmul.mubr.bf16.gmra.mrb[60].mxu1 %v2420_v31 }
  0xfb   : > { %v2061_v34 = vpop.f32.mrb[0].mxu0 }
  0xfc   : > { %v2173_v35 = vpop.f32.mrb[0].mxu1  ;;  %v2062_v36 = vpop.f32.mrb[1].mxu0 }
  0xfd   : > { %v2063_v37 = vadd.f32 %v2062_v36, %v2061_v34  ;;  %v2174_v38 = vpop.f32.mrb[1].mxu1  ;;  %v2064_v40 = vpop.f32.mrb[2].mxu0 }
  0xfe   : > { %v2175_v42 = vadd.f32 %v2174_v38, %v2173_v35  ;;  %v2176_v43 = vpop.f32.mrb[2].mxu1  ;;  %v2065_v44 = vpop.f32.mrb[3].mxu0  ;;  %v1451_v38 = vadd.s32 %v2657_v39, %v1418_v24 }
  0xff   : > { %v2066_v46 = vadd.f32 %v2065_v44, %v2064_v40  ;;  %v2177_v47 = vpop.f32.mrb[3].mxu1 }
 0x100   : > { %v1115_v48 = vadd.f32 %v2175_v42, %v2063_v37  ;;  %v2178_v50 = vadd.f32 %v2177_v47, %v2176_v43  ;;  %vm1483_vm5 = vcmp.lt.s32.totalorder %v1451_v38, 16 }
 0x102   : > { %v1347_v52 = vadd.f32 %v2663_v45, %v1115_v48  ;;  %v1118_v53 = vadd.f32 %v2178_v50, %v2066_v46  ;;  %v1419_v50 = vadd.s32 48, %v2654_v33 }
 0x103   : > { %v2067_v54 = vpop.f32.mrb[4].mxu0 }
 0x104   : > { %v1379_v55 = vmax.f32 %v1347_v52, 0.0  ;;  %v1348_v56 = vadd.f32 %v2663_v45, %v1118_v53  ;;  %v2179_v57 = vpop.f32.mrb[4].mxu1  ;;  %v2068_v58 = vpop.f32.mrb[5].mxu0  ;;  %v1420_v52 = vadd.s32 56, %v2654_v33 }
 0x105   : > { %v2069_v59 = vadd.f32 %v2068_v58, %v2067_v54  ;;  %v2180_v60 = vpop.f32.mrb[5].mxu1  ;;  %v2070_v62 = vpop.f32.mrb[6].mxu0 }
 0x106   : > { %v1380_v0 = vmax.f32 %v1348_v56, 0.0  ;;  %v2181_v1 = vadd.f32 %v2180_v60, %v2179_v57  ;;  %v2182_v2 = vpop.f32.mrb[6].mxu1  ;;  %v2071_v3 = vpop.f32.mrb[7].mxu0  ;;  %v1510_v6 = vsel %vm1478_vm0, %v1379_v55, 0.0 }
 0x107   : > { %v2072_v4 = vadd.f32 %v2071_v3, %v2070_v62  ;;  %v2183_v5 = vpop.f32.mrb[7].mxu1 }
 0x108   : > { %v1511_v7 = vsel %vm1479_vm1, %v1380_v0, 0.0  ;;  %v1123_v8 = vadd.f32 %v2181_v1, %v2069_v59  ;;  %v2184_v9 = vadd.f32 %v2183_v5, %v2182_v2  ;;  %v1452_v0 = vadd.s32 %v2657_v39, %v1419_v50 }
 0x109   : > { %v1953_v10 = vpack.c.bf16 %v1511_v7, %v1510_v6  ;;  %v1453_v1 = vadd.s32 %v2657_v39, %v1420_v52  ;;  %v1421_v5 = vadd.s32 64, %v2654_v33 }
 0x10a   : > { %v1349_v13 = vadd.f32 %v2663_v45, %v1123_v8  ;;  %v1126_v14 = vadd.f32 %v2184_v9, %v2072_v4  ;;  %vm1484_vm6 = vcmp.lt.s32.totalorder %v1452_v0, 16 }
 0x10b   : > { %1954 = vst [vmem:[%s2677_s25] sm:$0xff] %v1953_v10   ;;  %v2073_v15 = vpop.f32.mrb[8].mxu0  ;;  %vm1485_vm7 = vcmp.lt.s32.totalorder %v1453_v1, 16 }
 0x10c   : > { %v1381_v17 = vmax.f32 %v1349_v13, 0.0  ;;  %v1350_v18 = vadd.f32 %v2663_v45, %v1126_v14  ;;  %v2185_v19 = vpop.f32.mrb[8].mxu1  ;;  %v2074_v20 = vpop.f32.mrb[9].mxu0  ;;  %v1422_v13 = vadd.s32 72, %v2654_v33 }
 0x10d   : > { %v2075_v21 = vadd.f32 %v2074_v20, %v2073_v15  ;;  %v2186_v22 = vpop.f32.mrb[9].mxu1  ;;  %v2076_v23 = vpop.f32.mrb[10].mxu0 }
 0x10e   : > { %v1382_v25 = vmax.f32 %v1350_v18, 0.0  ;;  %v2187_v26 = vadd.f32 %v2186_v22, %v2185_v19  ;;  %v2188_v27 = vpop.f32.mrb[10].mxu1  ;;  %v2077_v28 = vpop.f32.mrb[11].mxu0  ;;  %v1512_v32 = vsel %vm1480_vm2, %v1381_v17, 0.0  ;;  %v1454_v18 = vadd.s32 %v2657_v39, %v1421_v5 }
 0x10f   : > { %v2078_v30 = vadd.f32 %v2077_v28, %v2076_v23  ;;  %v2189_v31 = vpop.f32.mrb[11].mxu1 }
 0x110   : > { %v1513_v34 = vsel %vm1481_vm3, %v1382_v25, 0.0  ;;  %v1131_v35 = vadd.f32 %v2187_v26, %v2075_v21  ;;  %v2190_v36 = vadd.f32 %v2189_v31, %v2188_v27  ;;  %v1455_v26 = vadd.s32 %v2657_v39, %v1422_v13 }
 0x111   : > { %v1958_v37 = vpack.c.bf16 %v1513_v34, %v1512_v32  ;;  %vm1486_vm8 = vcmp.lt.s32.totalorder %v1454_v18, 16 }
 0x112   : > { %v1351_v40 = vadd.f32 %v2663_v45, %v1131_v35  ;;  %v1134_v41 = vadd.f32 %v2190_v36, %v2078_v30  ;;  %vm1487_vm9 = vcmp.lt.s32.totalorder %v1455_v26, 16 }
 0x113   : > { %2030 = vst [vmem:[%s2677_s25 + $0x8] sm:$0xff] %v1958_v37   ;;  %v2079_v42 = vpop.f32.mrb[12].mxu0  ;;  %v1423_v37 = vadd.s32 80, %v2654_v33 }
 0x114   : > { %v1383_v43 = vmax.f32 %v1351_v40, 0.0  ;;  %v1352_v44 = vadd.f32 %v2663_v45, %v1134_v41  ;;  %v2191_v46 = vpop.f32.mrb[12].mxu1  ;;  %v2080_v47 = vpop.f32.mrb[13].mxu0  ;;  %v1424_v40 = vadd.s32 88, %v2654_v33 }
 0x115   : > { %v2081_v48 = vadd.f32 %v2080_v47, %v2079_v42  ;;  %v2192_v49 = vpop.f32.mrb[13].mxu1  ;;  %v2082_v51 = vpop.f32.mrb[14].mxu0 }
 0x116   : > { %v1384_v53 = vmax.f32 %v1352_v44, 0.0  ;;  %v2193_v54 = vadd.f32 %v2192_v49, %v2191_v46  ;;  %v2194_v55 = vpop.f32.mrb[14].mxu1  ;;  %v2083_v56 = vpop.f32.mrb[15].mxu0  ;;  %v1514_v59 = vsel %vm1482_vm4, %v1383_v43, 0.0 }
 0x117   : > { %v2084_v57 = vadd.f32 %v2083_v56, %v2082_v51  ;;  %v2195_v58 = vpop.f32.mrb[15].mxu1 }
 0x118   : > { %v1515_v60 = vsel %vm1483_vm5, %v1384_v53, 0.0  ;;  %v1139_v61 = vadd.f32 %v2193_v54, %v2081_v48  ;;  %v2196_v62 = vadd.f32 %v2195_v58, %v2194_v55  ;;  %v1456_v53 = vadd.s32 %v2657_v39, %v1423_v37 }
 0x119   : > { %v1963_v63 = vpack.c.bf16 %v1515_v60, %v1514_v59  ;;  %v1457_v54 = vadd.s32 %v2657_v39, %v1424_v40  ;;  %v1425_v58 = vadd.s32 96, %v2654_v33 }
 0x11a   : > { %v1353_v2 = vadd.f32 %v2663_v45, %v1139_v61  ;;  %v1142_v3 = vadd.f32 %v2196_v62, %v2084_v57  ;;  %vm1488_vm10 = vcmp.lt.s32.totalorder %v1456_v53, 16 }
 0x11b   : > { %2031 = vst [vmem:[%s2677_s25 + $0x10] sm:$0xff] %v1963_v63   ;;  %v2085_v4 = vpop.f32.mrb[16].mxu0  ;;  %vm1489_vm11 = vcmp.lt.s32.totalorder %v1457_v54, 16 }
 0x11c   : > { %v1385_v6 = vmax.f32 %v1353_v2, 0.0  ;;  %v1354_v7 = vadd.f32 %v2663_v45, %v1142_v3  ;;  %v2197_v8 = vpop.f32.mrb[16].mxu1  ;;  %v2086_v9 = vpop.f32.mrb[17].mxu0  ;;  %v1426_v2 = vadd.s32 104, %v2654_v33 }
 0x11d   : > { %v2087_v10 = vadd.f32 %v2086_v9, %v2085_v4  ;;  %v2198_v11 = vpop.f32.mrb[17].mxu1  ;;  %v2088_v12 = vpop.f32.mrb[18].mxu0 }
 0x11e   : > { %v1386_v14 = vmax.f32 %v1354_v7, 0.0  ;;  %v2199_v15 = vadd.f32 %v2198_v11, %v2197_v8  ;;  %v2200_v16 = vpop.f32.mrb[18].mxu1  ;;  %v2089_v17 = vpop.f32.mrb[19].mxu0  ;;  %v1516_v21 = vsel %vm1484_vm6, %v1385_v6, 0.0  ;;  %v1458_v7 = vadd.s32 %v2657_v39, %v1425_v58 }
 0x11f   : > { %v2090_v19 = vadd.f32 %v2089_v17, %v2088_v12  ;;  %v2201_v20 = vpop.f32.mrb[19].mxu1 }
 0x120   : > { %v1517_v22 = vsel %vm1485_vm7, %v1386_v14, 0.0  ;;  %v1147_v23 = vadd.f32 %v2199_v15, %v2087_v10  ;;  %v2202_v24 = vadd.f32 %v2201_v20, %v2200_v16  ;;  %v1459_v15 = vadd.s32 %v2657_v39, %v1426_v2 }
 0x121   : > { %v1968_v25 = vpack.c.bf16 %v1517_v22, %v1516_v21  ;;  %vm1490_vm12 = vcmp.lt.s32.totalorder %v1458_v7, 16 }
 0x122   : > { %v1355_v27 = vadd.f32 %v2663_v45, %v1147_v23  ;;  %v1150_v28 = vadd.f32 %v2202_v24, %v2090_v19  ;;  %vm1491_vm13 = vcmp.lt.s32.totalorder %v1459_v15, 16 }
 0x123   : > { %2032 = vst [vmem:[%s2677_s25 + $0x18] sm:$0xff] %v1968_v25   ;;  %v2091_v29 = vpop.f32.mrb[20].mxu0  ;;  %v1427_v25 = vadd.s32 112, %v2654_v33 }
 0x124   : > { %v1387_v30 = vmax.f32 %v1355_v27, 0.0  ;;  %v1356_v31 = vadd.f32 %v2663_v45, %v1150_v28  ;;  %v2203_v32 = vpop.f32.mrb[20].mxu1  ;;  %v2092_v34 = vpop.f32.mrb[21].mxu0  ;;  %v1428_v27 = vadd.s32 120, %v2654_v33 }
 0x125   : > { %v2093_v35 = vadd.f32 %v2092_v34, %v2091_v29  ;;  %v2204_v36 = vpop.f32.mrb[21].mxu1  ;;  %v2094_v38 = vpop.f32.mrb[22].mxu0 }
 0x126   : > { %v1388_v41 = vmax.f32 %v1356_v31, 0.0  ;;  %v2205_v42 = vadd.f32 %v2204_v36, %v2203_v32  ;;  %v2206_v43 = vpop.f32.mrb[22].mxu1  ;;  %v2095_v44 = vpop.f32.mrb[23].mxu0  ;;  %v1518_v48 = vsel %vm1486_vm8, %v1387_v30, 0.0 }
 0x127   : > { %v2096_v46 = vadd.f32 %v2095_v44, %v2094_v38  ;;  %v2207_v47 = vpop.f32.mrb[23].mxu1 }
 0x128   : > { %v1519_v49 = vsel %vm1487_vm9, %v1388_v41, 0.0  ;;  %v1155_v50 = vadd.f32 %v2205_v42, %v2093_v35  ;;  %v2208_v51 = vadd.f32 %v2207_v47, %v2206_v43  ;;  %v1460_v41 = vadd.s32 %v2657_v39, %v1427_v25 }
 0x129   : > { %v1973_v52 = vpack.c.bf16 %v1519_v49, %v1518_v48  ;;  %v1461_v42 = vadd.s32 %v2657_v39, %v1428_v27  ;;  %v1429_v47 = vadd.s32 128, %v2654_v33 }
 0x12a   : > { %v1357_v55 = vadd.f32 %v2663_v45, %v1155_v50  ;;  %v1158_v56 = vadd.f32 %v2208_v51, %v2096_v46  ;;  %vm1492_vm14 = vcmp.lt.s32.totalorder %v1460_v41, 16 }
 0x12b   : > { %2033 = vst [vmem:[%s2677_s25 + $0x20] sm:$0xff] %v1973_v52   ;;  %v2097_v57 = vpop.f32.mrb[24].mxu0  ;;  %vm1493_vm15 = vcmp.lt.s32.totalorder %v1461_v42, 16 }
 0x12c   : > { %v1389_v59 = vmax.f32 %v1357_v55, 0.0  ;;  %v1358_v60 = vadd.f32 %v2663_v45, %v1158_v56  ;;  %v2209_v61 = vpop.f32.mrb[24].mxu1  ;;  %v2098_v62 = vpop.f32.mrb[25].mxu0  ;;  %v1430_v55 = vadd.s32 136, %v2654_v33 }
 0x12d   : > { %v2099_v63 = vadd.f32 %v2098_v62, %v2097_v57  ;;  %v2210_v0 = vpop.f32.mrb[25].mxu1  ;;  %v2100_v1 = vpop.f32.mrb[26].mxu0 }
 0x12e   : > { %v1390_v3 = vmax.f32 %v1358_v60, 0.0  ;;  %v2211_v4 = vadd.f32 %v2210_v0, %v2209_v61  ;;  %v2212_v5 = vpop.f32.mrb[26].mxu1  ;;  %v2101_v6 = vpop.f32.mrb[27].mxu0  ;;  %v1520_v10 = vsel %vm1488_vm10, %v1389_v59, 0.0  ;;  %v1462_v60 = vadd.s32 %v2657_v39, %v1429_v47 }
 0x12f   : > { %v2102_v8 = vadd.f32 %v2101_v6, %v2100_v1  ;;  %v2213_v9 = vpop.f32.mrb[27].mxu1 }
 0x130   : > { %v1521_v11 = vsel %vm1489_vm11, %v1390_v3, 0.0  ;;  %v1163_v12 = vadd.f32 %v2211_v4, %v2099_v63  ;;  %v2214_v13 = vadd.f32 %v2213_v9, %v2212_v5  ;;  %v1463_v4 = vadd.s32 %v2657_v39, %v1430_v55 }
 0x131   : > { %v1978_v14 = vpack.c.bf16 %v1521_v11, %v1520_v10  ;;  %vm1494_vm0 = vcmp.lt.s32.totalorder %v1462_v60, 16 }
 0x132   : > { %v1359_v16 = vadd.f32 %v2663_v45, %v1163_v12  ;;  %v1166_v17 = vadd.f32 %v2214_v13, %v2102_v8  ;;  %vm1495_vm1 = vcmp.lt.s32.totalorder %v1463_v4, 16 }
 0x133   : > { %2034 = vst [vmem:[%s2677_s25 + $0x28] sm:$0xff] %v1978_v14   ;;  %v2103_v18 = vpop.f32.mrb[28].mxu0  ;;  %v1431_v14 = vadd.s32 144, %v2654_v33 }
 0x134   : > { %v1391_v19 = vmax.f32 %v1359_v16, 0.0  ;;  %v1360_v20 = vadd.f32 %v2663_v45, %v1166_v17  ;;  %v2215_v21 = vpop.f32.mrb[28].mxu1  ;;  %v2104_v22 = vpop.f32.mrb[29].mxu0  ;;  %v1432_v16 = vadd.s32 152, %v2654_v33 }
 0x135   : > { %v2105_v23 = vadd.f32 %v2104_v22, %v2103_v18  ;;  %v2216_v24 = vpop.f32.mrb[29].mxu1  ;;  %v2106_v26 = vpop.f32.mrb[30].mxu0 }
 0x136   : > { %v1392_v28 = vmax.f32 %v1360_v20, 0.0  ;;  %v2217_v29 = vadd.f32 %v2216_v24, %v2215_v21  ;;  %v2218_v30 = vpop.f32.mrb[30].mxu1  ;;  %v2107_v31 = vpop.f32.mrb[31].mxu0  ;;  %v1522_v35 = vsel %vm1490_vm12, %v1391_v19, 0.0 }
 0x137   : > { %v2108_v32 = vadd.f32 %v2107_v31, %v2106_v26  ;;  %v2219_v34 = vpop.f32.mrb[31].mxu1 }
 0x138   : > { %v1523_v36 = vsel %vm1491_vm13, %v1392_v28, 0.0  ;;  %v1171_v37 = vadd.f32 %v2217_v29, %v2105_v23  ;;  %v2220_v38 = vadd.f32 %v2219_v34, %v2218_v30  ;;  %v1464_v28 = vadd.s32 %v2657_v39, %v1431_v14 }
 0x139   : > { %v1983_v40 = vpack.c.bf16 %v1523_v36, %v1522_v35  ;;  %v1465_v29 = vadd.s32 %v2657_v39, %v1432_v16  ;;  %v1433_v34 = vadd.s32 160, %v2654_v33 }
 0x13a   : > { %v1361_v43 = vadd.f32 %v2663_v45, %v1171_v37  ;;  %v1174_v44 = vadd.f32 %v2220_v38, %v2108_v32  ;;  %vm1496_vm2 = vcmp.lt.s32.totalorder %v1464_v28, 16 }
 0x13b   : > { %2035 = vst [vmem:[%s2677_s25 + $0x30] sm:$0xff] %v1983_v40   ;;  %v2109_v46 = vpop.f32.mrb[32].mxu0  ;;  %vm1497_vm3 = vcmp.lt.s32.totalorder %v1465_v29, 16 }
 0x13c   : > { %v1393_v48 = vmax.f32 %v1361_v43, 0.0  ;;  %v1362_v49 = vadd.f32 %v2663_v45, %v1174_v44  ;;  %v2221_v50 = vpop.f32.mrb[32].mxu1  ;;  %v2110_v51 = vpop.f32.mrb[33].mxu0  ;;  %v1434_v43 = vadd.s32 168, %v2654_v33 }
 0x13d   : > { %v2111_v52 = vadd.f32 %v2110_v51, %v2109_v46  ;;  %v2222_v53 = vpop.f32.mrb[33].mxu1  ;;  %v2112_v54 = vpop.f32.mrb[34].mxu0 }
 0x13e   : > { %v1394_v56 = vmax.f32 %v1362_v49, 0.0  ;;  %v2223_v57 = vadd.f32 %v2222_v53, %v2221_v50  ;;  %v2224_v58 = vpop.f32.mrb[34].mxu1  ;;  %v2113_v59 = vpop.f32.mrb[35].mxu0  ;;  %v1524_v63 = vsel %vm1492_vm14, %v1393_v48, 0.0  ;;  %v1466_v49 = vadd.s32 %v2657_v39, %v1433_v34 }
 0x13f   : > { %v2114_v61 = vadd.f32 %v2113_v59, %v2112_v54  ;;  %v2225_v62 = vpop.f32.mrb[35].mxu1 }
 0x140   : > { %v1525_v0 = vsel %vm1493_vm15, %v1394_v56, 0.0  ;;  %v1179_v1 = vadd.f32 %v2223_v57, %v2111_v52  ;;  %v2226_v2 = vadd.f32 %v2225_v62, %v2224_v58  ;;  %v1467_v57 = vadd.s32 %v2657_v39, %v1434_v43 }
 0x141   : > { %v1988_v3 = vpack.c.bf16 %v1525_v0, %v1524_v63  ;;  %vm1498_vm4 = vcmp.lt.s32.totalorder %v1466_v49, 16 }
 0x142   : > { %v1363_v5 = vadd.f32 %v2663_v45, %v1179_v1  ;;  %v1182_v6 = vadd.f32 %v2226_v2, %v2114_v61  ;;  %vm1499_vm5 = vcmp.lt.s32.totalorder %v1467_v57, 16 }
 0x143   : > { %2036 = vst [vmem:[%s2677_s25 + $0x38] sm:$0xff] %v1988_v3   ;;  %v2115_v7 = vpop.f32.mrb[36].mxu0  ;;  %v1435_v3 = vadd.s32 176, %v2654_v33 }
 0x144   : > { %v1395_v8 = vmax.f32 %v1363_v5, 0.0  ;;  %v1364_v9 = vadd.f32 %v2663_v45, %v1182_v6  ;;  %v2227_v10 = vpop.f32.mrb[36].mxu1  ;;  %v2116_v11 = vpop.f32.mrb[37].mxu0  ;;  %v1436_v5 = vadd.s32 184, %v2654_v33 }
 0x145   : > { %v2117_v12 = vadd.f32 %v2116_v11, %v2115_v7  ;;  %v2228_v13 = vpop.f32.mrb[37].mxu1  ;;  %v2118_v15 = vpop.f32.mrb[38].mxu0 }
 0x146   : > { %v1396_v17 = vmax.f32 %v1364_v9, 0.0  ;;  %v2229_v18 = vadd.f32 %v2228_v13, %v2227_v10  ;;  %v2230_v19 = vpop.f32.mrb[38].mxu1  ;;  %v2119_v20 = vpop.f32.mrb[39].mxu0  ;;  %v1526_v23 = vsel %vm1494_vm0, %v1395_v8, 0.0 }
 0x147   : > { %v2120_v21 = vadd.f32 %v2119_v20, %v2118_v15  ;;  %v2231_v22 = vpop.f32.mrb[39].mxu1 }
 0x148   : > { %v1527_v24 = vsel %vm1495_vm1, %v1396_v17, 0.0  ;;  %v1187_v25 = vadd.f32 %v2229_v18, %v2117_v12  ;;  %v2232_v26 = vadd.f32 %v2231_v22, %v2230_v19  ;;  %v1468_v17 = vadd.s32 %v2657_v39, %v1435_v3 }
 0x149   : > { %v1993_v27 = vpack.c.bf16 %v1527_v24, %v1526_v23  ;;  %v1469_v18 = vadd.s32 %v2657_v39, %v1436_v5  ;;  %v1437_v22 = vadd.s32 192, %v2654_v33 }
 0x14a   : > { %v1365_v30 = vadd.f32 %v2663_v45, %v1187_v25  ;;  %v1190_v31 = vadd.f32 %v2232_v26, %v2120_v21  ;;  %vm1500_vm6 = vcmp.lt.s32.totalorder %v1468_v17, 16 }
 0x14b   : > { %2037 = vst [vmem:[%s2677_s25 + $0x40] sm:$0xff] %v1993_v27   ;;  %v2121_v32 = vpop.f32.mrb[40].mxu0  ;;  %vm1501_vm7 = vcmp.lt.s32.totalorder %v1469_v18, 16 }
 0x14c   : > { %v1397_v35 = vmax.f32 %v1365_v30, 0.0  ;;  %v1366_v36 = vadd.f32 %v2663_v45, %v1190_v31  ;;  %v2233_v37 = vpop.f32.mrb[40].mxu1  ;;  %v2122_v38 = vpop.f32.mrb[41].mxu0  ;;  %v1438_v30 = vadd.s32 200, %v2654_v33 }
 0x14d   : > { %v2123_v40 = vadd.f32 %v2122_v38, %v2121_v32  ;;  %v2234_v41 = vpop.f32.mrb[41].mxu1  ;;  %v2124_v42 = vpop.f32.mrb[42].mxu0 }
 0x14e   : > { %v1398_v44 = vmax.f32 %v1366_v36, 0.0  ;;  %v2235_v46 = vadd.f32 %v2234_v41, %v2233_v37  ;;  %v2236_v47 = vpop.f32.mrb[42].mxu1  ;;  %v2125_v48 = vpop.f32.mrb[43].mxu0  ;;  %v1528_v52 = vsel %vm1496_vm2, %v1397_v35, 0.0  ;;  %v1470_v36 = vadd.s32 %v2657_v39, %v1437_v22 }
 0x14f   : > { %v2126_v50 = vadd.f32 %v2125_v48, %v2124_v42  ;;  %v2237_v51 = vpop.f32.mrb[43].mxu1 }
 0x150   : > { %v1529_v53 = vsel %vm1497_vm3, %v1398_v44, 0.0  ;;  %v1195_v54 = vadd.f32 %v2235_v46, %v2123_v40  ;;  %v2238_v55 = vadd.f32 %v2237_v51, %v2236_v47  ;;  %v1471_v46 = vadd.s32 %v2657_v39, %v1438_v30 }
 0x151   : > { %v1998_v56 = vpack.c.bf16 %v1529_v53, %v1528_v52  ;;  %vm1502_vm8 = vcmp.lt.s32.totalorder %v1470_v36, 16 }
 0x152   : > { %v1367_v58 = vadd.f32 %v2663_v45, %v1195_v54  ;;  %v1198_v59 = vadd.f32 %v2238_v55, %v2126_v50  ;;  %vm1503_vm9 = vcmp.lt.s32.totalorder %v1471_v46, 16 }
 0x153   : > { %2038 = vst [vmem:[%s2677_s25 + $0x48] sm:$0xff] %v1998_v56   ;;  %v2127_v60 = vpop.f32.mrb[44].mxu0  ;;  %v1439_v56 = vadd.s32 208, %v2654_v33 }
 0x154   : > { %v1399_v61 = vmax.f32 %v1367_v58, 0.0  ;;  %v1368_v62 = vadd.f32 %v2663_v45, %v1198_v59  ;;  %v2239_v63 = vpop.f32.mrb[44].mxu1  ;;  %v2128_v0 = vpop.f32.mrb[45].mxu0  ;;  %v1440_v58 = vadd.s32 216, %v2654_v33 }
 0x155   : > { %v2129_v1 = vadd.f32 %v2128_v0, %v2127_v60  ;;  %v2240_v2 = vpop.f32.mrb[45].mxu1  ;;  %v2130_v4 = vpop.f32.mrb[46].mxu0 }
 0x156   : > { %v1400_v6 = vmax.f32 %v1368_v62, 0.0  ;;  %v2241_v7 = vadd.f32 %v2240_v2, %v2239_v63  ;;  %v2242_v8 = vpop.f32.mrb[46].mxu1  ;;  %v2131_v9 = vpop.f32.mrb[47].mxu0  ;;  %v1530_v12 = vsel %vm1498_vm4, %v1399_v61, 0.0 }
 0x157   : > { %v2132_v10 = vadd.f32 %v2131_v9, %v2130_v4  ;;  %v2243_v11 = vpop.f32.mrb[47].mxu1 }
 0x158   : > { %v1531_v13 = vsel %vm1499_vm5, %v1400_v6, 0.0  ;;  %v1203_v14 = vadd.f32 %v2241_v7, %v2129_v1  ;;  %v2244_v15 = vadd.f32 %v2243_v11, %v2242_v8  ;;  %v1472_v6 = vadd.s32 %v2657_v39, %v1439_v56 }
 0x159   : > { %v2003_v16 = vpack.c.bf16 %v1531_v13, %v1530_v12  ;;  %v1473_v7 = vadd.s32 %v2657_v39, %v1440_v58  ;;  %v1441_v11 = vadd.s32 224, %v2654_v33 }
 0x15a   : > { %v1369_v19 = vadd.f32 %v2663_v45, %v1203_v14  ;;  %v1206_v20 = vadd.f32 %v2244_v15, %v2132_v10  ;;  %vm1504_vm10 = vcmp.lt.s32.totalorder %v1472_v6, 16 }
 0x15b   : > { %2039 = vst [vmem:[%s2677_s25 + $0x50] sm:$0xff] %v2003_v16   ;;  %v2133_v21 = vpop.f32.mrb[48].mxu0  ;;  %vm1505_vm11 = vcmp.lt.s32.totalorder %v1473_v7, 16 }
 0x15c   : > { %v1401_v23 = vmax.f32 %v1369_v19, 0.0  ;;  %v1370_v24 = vadd.f32 %v2663_v45, %v1206_v20  ;;  %v2245_v25 = vpop.f32.mrb[48].mxu1  ;;  %v2134_v26 = vpop.f32.mrb[49].mxu0  ;;  %v1442_v19 = vadd.s32 232, %v2654_v33 }
 0x15d   : > { %v2135_v27 = vadd.f32 %v2134_v26, %v2133_v21  ;;  %v2246_v28 = vpop.f32.mrb[49].mxu1  ;;  %v2136_v29 = vpop.f32.mrb[50].mxu0 }
 0x15e   : > { %v1402_v31 = vmax.f32 %v1370_v24, 0.0  ;;  %v2247_v32 = vadd.f32 %v2246_v28, %v2245_v25  ;;  %v2248_v34 = vpop.f32.mrb[50].mxu1  ;;  %v2137_v35 = vpop.f32.mrb[51].mxu0  ;;  %v1532_v40 = vsel %vm1500_vm6, %v1401_v23, 0.0  ;;  %v1474_v24 = vadd.s32 %v2657_v39, %v1441_v11 }
 0x15f   : > { %v2138_v37 = vadd.f32 %v2137_v35, %v2136_v29  ;;  %v2249_v38 = vpop.f32.mrb[51].mxu1 }
 0x160   : > { %v1533_v41 = vsel %vm1501_vm7, %v1402_v31, 0.0  ;;  %v1211_v42 = vadd.f32 %v2247_v32, %v2135_v27  ;;  %v2250_v43 = vadd.f32 %v2249_v38, %v2248_v34  ;;  %v1475_v32 = vadd.s32 %v2657_v39, %v1442_v19 }
 0x161   : > { %v2008_v44 = vpack.c.bf16 %v1533_v41, %v1532_v40  ;;  %vm1506_vm12 = vcmp.lt.s32.totalorder %v1474_v24, 16 }
 0x162   : > { %v1371_v47 = vadd.f32 %v2663_v45, %v1211_v42  ;;  %v1214_v48 = vadd.f32 %v2250_v43, %v2138_v37  ;;  %vm1507_vm13 = vcmp.lt.s32.totalorder %v1475_v32, 16 }
 0x163   : > { %2040 = vst [vmem:[%s2677_s25 + $0x58] sm:$0xff] %v2008_v44   ;;  %v2139_v49 = vpop.f32.mrb[52].mxu0  ;;  %v1443_v44 = vadd.s32 240, %v2654_v33 }
 0x164   : > { %v1403_v50 = vmax.f32 %v1371_v47, 0.0  ;;  %v1372_v51 = vadd.f32 %v2663_v45, %v1214_v48  ;;  %v2251_v52 = vpop.f32.mrb[52].mxu1  ;;  %v2140_v53 = vpop.f32.mrb[53].mxu0  ;;  %v1444_v47 = vadd.s32 248, %v2654_v33 }
 0x165   : > { %v2141_v54 = vadd.f32 %v2140_v53, %v2139_v49  ;;  %v2252_v55 = vpop.f32.mrb[53].mxu1  ;;  %v2142_v57 = vpop.f32.mrb[54].mxu0 }
 0x166   : > { %v1404_v59 = vmax.f32 %v1372_v51, 0.0  ;;  %v2253_v60 = vadd.f32 %v2252_v55, %v2251_v52  ;;  %v2254_v61 = vpop.f32.mrb[54].mxu1  ;;  %v2143_v62 = vpop.f32.mrb[55].mxu0  ;;  %v1534_v1 = vsel %vm1502_vm8, %v1403_v50, 0.0 }
 0x167   : > { %v2144_v63 = vadd.f32 %v2143_v62, %v2142_v57  ;;  %v2255_v0 = vpop.f32.mrb[55].mxu1 }
 0x168   : > { %v1535_v2 = vsel %vm1503_vm9, %v1404_v59, 0.0  ;;  %v1219_v3 = vadd.f32 %v2253_v60, %v2141_v54  ;;  %v2256_v4 = vadd.f32 %v2255_v0, %v2254_v61  ;;  %v1476_v59 = vadd.s32 %v2657_v39, %v1443_v44 }
 0x169   : > { %v2013_v5 = vpack.c.bf16 %v1535_v2, %v1534_v1  ;;  %v1477_v60 = vadd.s32 %v2657_v39, %v1444_v47 }
 0x16a   : > { %v1373_v8 = vadd.f32 %v2663_v45, %v1219_v3  ;;  %v1222_v9 = vadd.f32 %v2256_v4, %v2144_v63  ;;  %vm1508_vm14 = vcmp.lt.s32.totalorder %v1476_v59, 16 }
 0x16b   : > { %2041 = vst [vmem:[%s2677_s25 + $0x60] sm:$0xff] %v2013_v5   ;;  %v2145_v10 = vpop.f32.mrb[56].mxu0  ;;  %vm1509_vm15 = vcmp.lt.s32.totalorder %v1477_v60, 16 }
 0x16c   : > { %v1405_v12 = vmax.f32 %v1373_v8, 0.0  ;;  %v1374_v13 = vadd.f32 %v2663_v45, %v1222_v9  ;;  %v2257_v14 = vpop.f32.mrb[56].mxu1  ;;  %v2146_v15 = vpop.f32.mrb[57].mxu0 }
 0x16d   : > { %v2147_v16 = vadd.f32 %v2146_v15, %v2145_v10  ;;  %v2258_v17 = vpop.f32.mrb[57].mxu1  ;;  %v2148_v18 = vpop.f32.mrb[58].mxu0 }
 0x16e   : > { %v1406_v20 = vmax.f32 %v1374_v13, 0.0  ;;  %v2259_v21 = vadd.f32 %v2258_v17, %v2257_v14  ;;  %v2260_v22 = vpop.f32.mrb[58].mxu1  ;;  %v2149_v23 = vpop.f32.mrb[59].mxu0  ;;  %v1536_v27 = vsel %vm1504_vm10, %v1405_v12, 0.0 }
 0x16f   : > { %v2150_v25 = vadd.f32 %v2149_v23, %v2148_v18  ;;  %v2261_v26 = vpop.f32.mrb[59].mxu1 }
 0x170   : > { %v1537_v28 = vsel %vm1505_vm11, %v1406_v20, 0.0  ;;  %v1227_v29 = vadd.f32 %v2259_v21, %v2147_v16  ;;  %v2262_v30 = vadd.f32 %v2261_v26, %v2260_v22 }
 0x171   : > { %v2018_v31 = vpack.c.bf16 %v1537_v28, %v1536_v27 }
 0x172   : > { %v1375_v34 = vadd.f32 %v2663_v45, %v1227_v29  ;;  %v1230_v35 = vadd.f32 %v2262_v30, %v2150_v25 }
 0x173   : > { %2042 = vst [vmem:[%s2677_s25 + $0x68] sm:$0xff] %v2018_v31   ;;  %v2151_v36 = vpop.f32.mrb[60].mxu0 }
 0x174   : > { %v1407_v37 = vmax.f32 %v1375_v34, 0.0  ;;  %v1376_v38 = vadd.f32 %v2663_v45, %v1230_v35  ;;  %v2263_v40 = vpop.f32.mrb[60].mxu1  ;;  %v2152_v41 = vpop.f32.mrb[61].mxu0 }
 0x175   : > { %v2153_v42 = vadd.f32 %v2152_v41, %v2151_v36  ;;  %v2264_v43 = vpop.f32.mrb[61].mxu1  ;;  %v2154_v46 = vpop.f32.mrb[62].mxu0 }
 0x176   : > { %v1408_v48 = vmax.f32 %v1376_v38, 0.0  ;;  %v2265_v49 = vadd.f32 %v2264_v43, %v2263_v40  ;;  %v2266_v50 = vpop.f32.mrb[62].mxu1  ;;  %v2155_v51 = vpop.f32.mrb[63].mxu0  ;;  %v1538_v54 = vsel %vm1506_vm12, %v1407_v37, 0.0 }
 0x177   : > { %v2156_v52 = vadd.f32 %v2155_v51, %v2154_v46  ;;  %v2267_v53 = vpop.f32.mrb[63].mxu1 }
 0x178   : > { %v1539_v55 = vsel %vm1507_vm13, %v1408_v48, 0.0  ;;  %v1235_v56 = vadd.f32 %v2265_v49, %v2153_v42  ;;  %v2268_v57 = vadd.f32 %v2267_v53, %v2266_v50 }
 0x179   : > { %v2023_v58 = vpack.c.bf16 %v1539_v55, %v1538_v54 }
 0x17a   : > { %v1377_v33 = vadd.f32 %v2663_v45, %v1235_v56  ;;  %v1238_v61 = vadd.f32 %v2268_v57, %v2156_v52 }
 0x17b   : > { %2043 = vst [vmem:[%s2677_s25 + $0x70] sm:$0xff] %v2023_v58  }
 0x17c   : > { %v1409_v62 = vmax.f32 %v1377_v33, 0.0  ;;  %v1378_v63 = vadd.f32 %v2663_v45, %v1238_v61 }
 0x17e   : > { %v1410_v0 = vmax.f32 %v1378_v63, 0.0  ;;  %v1540_v1 = vsel %vm1508_vm14, %v1409_v62, 0.0 }
 0x180   : > { %v1541_v2 = vsel %vm1509_vm15, %v1410_v0, 0.0 }
 0x181   : > { %v2028_v3 = vpack.c.bf16 %v1541_v2, %v1540_v1 }
 0x183   : > { %2044 = vst [vmem:[%s2677_s25 + $0x78] sm:$0xff] %v2028_v3  }
 0x184 PF: > { %s13_s14 = sadd.s32 1, %s2443_s14   ;;  %s2803_s12 = smov %s2439_s13 }
 0x185   : > { %p10_p5 = scmp.ge.s32.totalorder %s13_s14, 4   ;;  %s2804_s13 = smov %s2806_s15 }
 0x187   :  { %12 = sbr.rel (!%p10_p5) target bundleno = 2 (0x2), region = 71 }

// kernel: gcn_forward.7
= control target key start
LH: loop header
LB: loop body
LE: loop exit
PB: predicated region body
PF: predicated region fallthrough
CT: control target
= control target key end

     0   :  { %s2594_s24 = smov 0   ;;  %s2596_s25 = smov 0   ;;  %s2995_s0 = inlined_call_operand.vmem [shape: bf16[512,512], index: 0, kind: input, shape index: {}]   ;;  %s2996_s1 = inlined_call_operand.vmem [shape: bf16[512,128], index: 1, kind: input, shape index: {}]   ;;  %s2997_s2 = inlined_call_operand.vmem [shape: f32[1,128], index: 2, kind: input, shape index: {}]   ;;  %s2998_s3 = inlined_call_operand.vmem [shape: bf16[8,512], index: 3, kind: input, shape index: {}]   ;;  %s2999_s4 = inlined_call_operand.vmem [shape: f32[8,1], index: 4, kind: input, shape index: {}]   ;;  %s3000_s5 = inlined_call_operand.vmem [shape: bf16[128,128], index: 5, kind: input, shape index: {}]   ;;  %s3001_s6 = inlined_call_operand.vmem [shape: f32[1,128], index: 6, kind: input, shape index: {}]   ;;  %s3002_s7 = inlined_call_operand.vmem [shape: f32[8,128], index: 7, kind: output, shape index: {}]  }
   0x1   :  { %s2598_s26 = smov 0  }
   0x2 LB: > { %s29_s27 = sadd.s32 1, %s2544_s25  ;;  %p1914_p0 = scmp.ge.s32.totalorder %s2548_s26, 1  ;;  %s2548_s26 = sphi %s2598_s26, %s17_s26   ;;  %s2544_s25 = sphi %s2596_s25, %s3004_s25   ;;  %s2540_s24 = sphi %s2594_s24, %s3003_s24  }
   0x3   : > { %p31_p1 = scmp.ge.s32.totalorder %s29_s27, 2  ;;  %p264_p2 = scmp.lt.s32.totalorder %s2548_s26, 3 }
   0x5   : > { %s3006_s27 = smov (%p31_p1, %s29_s27), 0  ;;  %p265_p3 = pnand %p1914_p0, %p264_p2 }
   0x6   : > { %s1915_s28 = sshll.u32 (!%p265_p3), %s2540_s24, 5  ;;  %s1918_s29 = sshll.u32 (!%p265_p3), %s2540_s24, 1 }
   0x7   : > { %268 = sbr.rel (%p265_p3) target bundleno = 852 (0x354), region = 48  ;;  %p303_p4 = scmp.lt.s32.totalorder (!%p265_p3), %s1915_s28, 63 }
   0x8   : > { %p314_p5 = scmp.lt.s32.totalorder (!%p265_p3), %s1918_s29, 3  ;;  %p320_p6 = scmp.eq.s32.totalorder (!%p265_p3), %s2540_s24, 0 }
   0xe   : > { %s3008_s28 = smov (!%p303_p4, %s1915_s28), 63  ;;  %s3010_s29 = smov (!%p314_p5, %s1918_s29), 3 }
   0xf   : > { %s2081_s30 = sshll.u32 %s3008_s28, 4  ;;  %s1919_s11 = sshll.u32 %s3010_s29, 2  ;;  %v2550_v0 = vmov (%p320_p6), 0.0  }
  0x10   : > { %s2620_s10 = scalar_lea.vmem %s2995_s0, %s2081_s30  ;;  %s2625_s14 = scalar_lea.vmem %s2998_s3, %s1919_s11  ;;  %326 = vst [vmem:[#allocation3] sm:$0xff] (%p320_p6), %v2550_v0 }
  0x11   : > { %325 = sbr.rel (!%p320_p6) target bundleno = 24 (0x18), region = 52 }
  0x18 PF: > { %v2387_v1 = vld [vmem:[%s2996_s1 + $0x40] sm:$0xff]   ;;  %v2391_v5 = vld [vmem:[%s2996_s1 + $0x48] sm:$0xff]   ;;  %v2395_v9 = vld [vmem:[%s2996_s1 + $0x50] sm:$0xff]   ;;  %p1729_p7 = scmp.eq.s32.totalorder %s2540_s24, 1 }
  0x19   : > { %v2388_v2 = vld [vmem:[%s2996_s1 + $0xc0] sm:$0xff]   ;;  %2084 = vmatprep.subr.bf16.mxu0 %v2387_v1  ;;  %v2392_v6 = vld [vmem:[%s2996_s1 + $0xc8] sm:$0xff]   ;;  %v2396_v10 = vld [vmem:[%s2996_s1 + $0xd0] sm:$0xff]  }
  0x1a   : > { %v2389_v3 = vld [vmem:[%s2996_s1] sm:$0xff]   ;;  %2196 = vmatprep.subr.bf16.mxu1 %v2388_v2  ;;  %v2393_v7 = vld [vmem:[%s2996_s1 + $0x8] sm:$0xff]   ;;  %v2397_v11 = vld [vmem:[%s2996_s1 + $0x10] sm:$0xff]  }
  0x1b   : > { %v2390_v4 = vld [vmem:[%s2996_s1 + $0x80] sm:$0xff]   ;;  %2085 = vmatpush3.bf16.msra.mxu0 %v2389_v3  ;;  %v2394_v8 = vld [vmem:[%s2996_s1 + $0x88] sm:$0xff]   ;;  %v2398_v12 = vld [vmem:[%s2996_s1 + $0x90] sm:$0xff]  }
  0x1c   : > { %2197 = vmatpush3.bf16.msra.mxu1 %v2390_v4  ;;  %2086 = vmatprep.subr.bf16.mxu0 %v2391_v5  ;;  %v2399_v13 = vld [vmem:[%s2996_s1 + $0x58] sm:$0xff]   ;;  %v2403_v17 = vld [vmem:[%s2996_s1 + $0x60] sm:$0xff]   ;;  %v2407_v21 = vld [vmem:[%s2996_s1 + $0x68] sm:$0xff]  }
  0x1d   : > { %2198 = vmatprep.subr.bf16.mxu1 %v2392_v6  ;;  %v2400_v14 = vld [vmem:[%s2996_s1 + $0xd8] sm:$0xff]   ;;  %v2404_v18 = vld [vmem:[%s2996_s1 + $0xe0] sm:$0xff]   ;;  %v2408_v22 = vld [vmem:[%s2996_s1 + $0xe8] sm:$0xff]  }
  0x1e   : > { %v2401_v15 = vld [vmem:[%s2996_s1 + $0x18] sm:$0xff]   ;;  %v2405_v19 = vld [vmem:[%s2996_s1 + $0x20] sm:$0xff]   ;;  %v2409_v23 = vld [vmem:[%s2996_s1 + $0x28] sm:$0xff]  }
  0x1f   : > { %2087 = vmatpush3.bf16.msra.mxu0 %v2393_v7  ;;  %v2402_v16 = vld [vmem:[%s2996_s1 + $0x98] sm:$0xff]   ;;  %v2406_v20 = vld [vmem:[%s2996_s1 + $0xa0] sm:$0xff]   ;;  %v2410_v24 = vld [vmem:[%s2996_s1 + $0xa8] sm:$0xff]  }
  0x20   : > { %2199 = vmatpush3.bf16.msra.mxu1 %v2394_v8  ;;  %2088 = vmatprep.subr.bf16.mxu0 %v2395_v9  ;;  %v2411_v25 = vld [vmem:[%s2996_s1 + $0x70] sm:$0xff]   ;;  %v2415_v29 = vld [vmem:[%s2996_s1 + $0x78] sm:$0xff]  }
  0x21   : > { %2200 = vmatprep.subr.bf16.mxu1 %v2396_v10  ;;  %v2412_v26 = vld [vmem:[%s2996_s1 + $0xf0] sm:$0xff]   ;;  %v2416_v30 = vld [vmem:[%s2996_s1 + $0xf8] sm:$0xff]  }
  0x22   : > { %v2413_v27 = vld [vmem:[%s2996_s1 + $0x30] sm:$0xff]   ;;  %v2417_v31 = vld [vmem:[%s2996_s1 + $0x38] sm:$0xff]  }
  0x23   : > { %2089 = vmatpush3.bf16.msra.mxu0 %v2397_v11  ;;  %v2414_v28 = vld [vmem:[%s2996_s1 + $0xb0] sm:$0xff]   ;;  %v2418_v32 = vld [vmem:[%s2996_s1 + $0xb8] sm:$0xff]  }
  0x24   : > { %2201 = vmatpush3.bf16.msra.mxu1 %v2398_v12  ;;  %2090 = vmatprep.subr.bf16.mxu0 %v2399_v13  ;;  %v2419_v33 = vld [vmem:[%s2620_s10] ss:$16 sps:$4 sm:$0xff]   ;;  %v2421_v34 = vld [vmem:[%s2620_s10 + $0x4] ss:$16 sps:$4 sm:$0xff]   ;;  %v2422_v35 = vld [vmem:[%s2620_s10 + $0x8] ss:$16 sps:$4 sm:$0xff]  }
  0x25   : > { %2202 = vmatprep.subr.bf16.mxu1 %v2400_v14  ;;  %v2424_v36 = vld [vmem:[%s2620_s10 + $0xc] ss:$16 sps:$4 sm:$0xff]   ;;  %1071 = vmatprep.mubr.bf16.mxu0 %v2421_v34  ;;  %v2425_v37 = vld [vmem:[%s2620_s10 + $0x24] ss:$16 sps:$4 sm:$0xff]   ;;  %v2429_v39 = vld [vmem:[%s2620_s10 + $0x20] ss:$16 sps:$4 sm:$0xff]  }
  0x26   : > { %1232 = vmatprep.mubr.bf16.mxu1 %v2424_v36  ;;  %v2427_v38 = vld [vmem:[%s2620_s10 + $0x2c] ss:$16 sps:$4 sm:$0xff]   ;;  %v2430_v40 = vld [vmem:[%s2620_s10 + $0x28] ss:$16 sps:$4 sm:$0xff]   ;;  %v2431_v41 = vld [vmem:[%s2620_s10 + $0x44] ss:$16 sps:$4 sm:$0xff]  }
  0x27   : > { %2091 = vmatpush3.bf16.msra.mxu0 %v2401_v15  ;;  %v2433_v42 = vld [vmem:[%s2620_s10 + $0x4c] ss:$16 sps:$4 sm:$0xff]   ;;  %v2435_v43 = vld [vmem:[%s2620_s10 + $0x40] ss:$16 sps:$4 sm:$0xff]   ;;  %v2436_v44 = vld [vmem:[%s2620_s10 + $0x48] ss:$16 sps:$4 sm:$0xff]  }
  0x28   : > { %2203 = vmatpush3.bf16.msra.mxu1 %v2402_v16  ;;  %2092 = vmatprep.subr.bf16.mxu0 %v2403_v17  ;;  %v2437_v45 = vld [vmem:[%s2620_s10 + $0x64] ss:$16 sps:$4 sm:$0xff]   ;;  %v2439_v46 = vld [vmem:[%s2620_s10 + $0x6c] ss:$16 sps:$4 sm:$0xff]   ;;  %v2441_v47 = vld [vmem:[%s2620_s10 + $0x60] ss:$16 sps:$4 sm:$0xff]  }
  0x29   : > { %2204 = vmatprep.subr.bf16.mxu1 %v2404_v18  ;;  %v2442_v48 = vld [vmem:[%s2620_s10 + $0x68] ss:$16 sps:$4 sm:$0xff]   ;;  %v2443_v49 = vld [vmem:[%s2620_s10 + $0x84] ss:$16 sps:$4 sm:$0xff]   ;;  %v2445_v50 = vld [vmem:[%s2620_s10 + $0x8c] ss:$16 sps:$4 sm:$0xff]  }
  0x2a   : > { %v2447_v51 = vld [vmem:[%s2620_s10 + $0x80] ss:$16 sps:$4 sm:$0xff]   ;;  %v2448_v52 = vld [vmem:[%s2620_s10 + $0x88] ss:$16 sps:$4 sm:$0xff]   ;;  %v2449_v53 = vld [vmem:[%s2620_s10 + $0xa4] ss:$16 sps:$4 sm:$0xff]  }
  0x2b   : > { %2093 = vmatpush3.bf16.msra.mxu0 %v2405_v19  ;;  %v2451_v54 = vld [vmem:[%s2620_s10 + $0xac] ss:$16 sps:$4 sm:$0xff]   ;;  %v2453_v55 = vld [vmem:[%s2620_s10 + $0xa0] ss:$16 sps:$4 sm:$0xff]   ;;  %v2454_v56 = vld [vmem:[%s2620_s10 + $0xa8] ss:$16 sps:$4 sm:$0xff]  }
  0x2c   : > { %2205 = vmatpush3.bf16.msra.mxu1 %v2406_v20  ;;  %2094 = vmatprep.subr.bf16.mxu0 %v2407_v21  ;;  %v2455_v57 = vld [vmem:[%s2620_s10 + $0xc4] ss:$16 sps:$4 sm:$0xff]   ;;  %v2457_v58 = vld [vmem:[%s2620_s10 + $0xcc] ss:$16 sps:$4 sm:$0xff]   ;;  %v2459_v59 = vld [vmem:[%s2620_s10 + $0xc0] ss:$16 sps:$4 sm:$0xff]  }
  0x2d   : > { %2206 = vmatprep.subr.bf16.mxu1 %v2408_v22  ;;  %v2460_v60 = vld [vmem:[%s2620_s10 + $0xc8] ss:$16 sps:$4 sm:$0xff]   ;;  %v2461_v61 = vld [vmem:[%s2620_s10 + $0xe4] ss:$16 sps:$4 sm:$0xff]   ;;  %v2463_v62 = vld [vmem:[%s2620_s10 + $0xec] ss:$16 sps:$4 sm:$0xff]  }
  0x2e   : > { %v2465_v63 = vld [vmem:[%s2620_s10 + $0xe0] ss:$16 sps:$4 sm:$0xff]   ;;  %v2466_v0 = vld [vmem:[%s2620_s10 + $0xe8] ss:$16 sps:$4 sm:$0xff]   ;;  %v2467_v1 = vld [vmem:[%s2620_s10 + $0x104] ss:$16 sps:$4 sm:$0xff]  }
  0x2f   : > { %2095 = vmatpush3.bf16.msra.mxu0 %v2409_v23  ;;  %v2469_v2 = vld [vmem:[%s2620_s10 + $0x10c] ss:$16 sps:$4 sm:$0xff]   ;;  %v2471_v3 = vld [vmem:[%s2620_s10 + $0x100] ss:$16 sps:$4 sm:$0xff]   ;;  %v2472_v4 = vld [vmem:[%s2620_s10 + $0x108] ss:$16 sps:$4 sm:$0xff]  }
  0x30   : > { %2207 = vmatpush3.bf16.msra.mxu1 %v2410_v24  ;;  %2096 = vmatprep.subr.bf16.mxu0 %v2411_v25  ;;  %v2473_v5 = vld [vmem:[%s2620_s10 + $0x124] ss:$16 sps:$4 sm:$0xff]   ;;  %v2475_v6 = vld [vmem:[%s2620_s10 + $0x12c] ss:$16 sps:$4 sm:$0xff]   ;;  %v2477_v7 = vld [vmem:[%s2620_s10 + $0x120] ss:$16 sps:$4 sm:$0xff]  }
  0x31   : > { %2208 = vmatprep.subr.bf16.mxu1 %v2412_v26  ;;  %v2478_v8 = vld [vmem:[%s2620_s10 + $0x128] ss:$16 sps:$4 sm:$0xff]   ;;  %v2479_v9 = vld [vmem:[%s2620_s10 + $0x144] ss:$16 sps:$4 sm:$0xff]   ;;  %v2481_v10 = vld [vmem:[%s2620_s10 + $0x14c] ss:$16 sps:$4 sm:$0xff]  }
  0x32   : > { %v2483_v11 = vld [vmem:[%s2620_s10 + $0x140] ss:$16 sps:$4 sm:$0xff]   ;;  %v2484_v12 = vld [vmem:[%s2620_s10 + $0x148] ss:$16 sps:$4 sm:$0xff]   ;;  %v2485_v13 = vld [vmem:[%s2620_s10 + $0x164] ss:$16 sps:$4 sm:$0xff]  }
  0x33   : > { %2097 = vmatpush3.bf16.msra.mxu0 %v2413_v27  ;;  %v2487_v14 = vld [vmem:[%s2620_s10 + $0x16c] ss:$16 sps:$4 sm:$0xff]   ;;  %v2489_v15 = vld [vmem:[%s2620_s10 + $0x160] ss:$16 sps:$4 sm:$0xff]   ;;  %v2490_v16 = vld [vmem:[%s2620_s10 + $0x168] ss:$16 sps:$4 sm:$0xff]  }
  0x34   : > { %2209 = vmatpush3.bf16.msra.mxu1 %v2414_v28  ;;  %2098 = vmatprep.subr.bf16.mxu0 %v2415_v29  ;;  %v2491_v17 = vld [vmem:[%s2620_s10 + $0x184] ss:$16 sps:$4 sm:$0xff]   ;;  %v2493_v18 = vld [vmem:[%s2620_s10 + $0x18c] ss:$16 sps:$4 sm:$0xff]   ;;  %v2495_v19 = vld [vmem:[%s2620_s10 + $0x180] ss:$16 sps:$4 sm:$0xff]  }
  0x35   : > { %2210 = vmatprep.subr.bf16.mxu1 %v2416_v30  ;;  %v2496_v20 = vld [vmem:[%s2620_s10 + $0x188] ss:$16 sps:$4 sm:$0xff]   ;;  %v2497_v21 = vld [vmem:[%s2620_s10 + $0x1a4] ss:$16 sps:$4 sm:$0xff]   ;;  %v2499_v22 = vld [vmem:[%s2620_s10 + $0x1ac] ss:$16 sps:$4 sm:$0xff]  }
  0x36   : > { %v2501_v23 = vld [vmem:[%s2620_s10 + $0x1a0] ss:$16 sps:$4 sm:$0xff]   ;;  %v2502_v24 = vld [vmem:[%s2620_s10 + $0x1a8] ss:$16 sps:$4 sm:$0xff]   ;;  %v2503_v25 = vld [vmem:[%s2620_s10 + $0x1c4] ss:$16 sps:$4 sm:$0xff]  }
  0x37   : > { %2099 = vmatpush3.bf16.msra.mxu0 %v2417_v31  ;;  %v2505_v26 = vld [vmem:[%s2620_s10 + $0x1cc] ss:$16 sps:$4 sm:$0xff]   ;;  %v2507_v27 = vld [vmem:[%s2620_s10 + $0x1c0] ss:$16 sps:$4 sm:$0xff]   ;;  %v2508_v28 = vld [vmem:[%s2620_s10 + $0x1c8] ss:$16 sps:$4 sm:$0xff]  }
  0x38   : > { %2211 = vmatpush3.bf16.msra.mxu1 %v2418_v32  ;;  %v2509_v29 = vld [vmem:[%s2620_s10 + $0x1e4] ss:$16 sps:$4 sm:$0xff]   ;;  %v2511_v30 = vld [vmem:[%s2620_s10 + $0x1ec] ss:$16 sps:$4 sm:$0xff]   ;;  %v2513_v31 = vld [vmem:[%s2620_s10 + $0x1e0] ss:$16 sps:$4 sm:$0xff]  }
  0x39   : > { %v2514_v32 = vld [vmem:[%s2620_s10 + $0x1e8] ss:$16 sps:$4 sm:$0xff]   ;;  %s2018_s10 = sshll.u32 %s2540_s24, 8 }
  0x3a   : > { %1072 = vmatmul.mubr.bf16.vlgmr.msra.gmra.mrb[0].mxu0 %v2419_v33 }
  0x3b   : > { %1233 = vmatmul.mubr.bf16.vlgmr.msra.gmra.mrb[0].mxu1 %v2422_v35  ;;  %1079 = vmatprep.mubr.bf16.mxu0 %v2425_v37 }
  0x3c   : > { %1240 = vmatprep.mubr.bf16.mxu1 %v2427_v38 }
  0x42   : > { %1080 = vmatmul.mubr.bf16.gmra.mrb[4].mxu0 %v2429_v39 }
  0x43   : > { %1241 = vmatmul.mubr.bf16.gmra.mrb[4].mxu1 %v2430_v40  ;;  %1087 = vmatprep.mubr.bf16.mxu0 %v2431_v41 }
  0x44   : > { %1248 = vmatprep.mubr.bf16.mxu1 %v2433_v42  ;;  %v2790_v42 = vld [vmem:[%s2997_s2] ss:$0 sm:$0xff] }
  0x4a   : > { %1088 = vmatmul.mubr.bf16.gmra.mrb[8].mxu0 %v2435_v43 }
  0x4b   : > { %1249 = vmatmul.mubr.bf16.gmra.mrb[8].mxu1 %v2436_v44  ;;  %1095 = vmatprep.mubr.bf16.mxu0 %v2437_v45 }
  0x4c   : > { %1256 = vmatprep.mubr.bf16.mxu1 %v2439_v46 }
  0x52   : > { %1096 = vmatmul.mubr.bf16.gmra.mrb[12].mxu0 %v2441_v47 }
  0x53   : > { %1257 = vmatmul.mubr.bf16.gmra.mrb[12].mxu1 %v2442_v48  ;;  %1103 = vmatprep.mubr.bf16.mxu0 %v2443_v49  ;;  %v2794_v49 = vld [vmem:[%s2625_s14] sm:$0xff] }
  0x54   : > { %1264 = vmatprep.mubr.bf16.mxu1 %v2445_v50 }
  0x5a   : > { %1104 = vmatmul.mubr.bf16.gmra.mrb[16].mxu0 %v2447_v51  ;;  %v2020_v51 = vcombine.high %v2794_v49, %v2794_v49 }
  0x5b   : > { %1265 = vmatmul.mubr.bf16.gmra.mrb[16].mxu1 %v2448_v52  ;;  %1111 = vmatprep.mubr.bf16.mxu0 %v2449_v53 }
  0x5c   : > { %1272 = vmatprep.mubr.bf16.mxu1 %v2451_v54 }
  0x62   : > { %1112 = vmatmul.mubr.bf16.gmra.mrb[20].mxu0 %v2453_v55 }
  0x63   : > { %1273 = vmatmul.mubr.bf16.gmra.mrb[20].mxu1 %v2454_v56  ;;  %1119 = vmatprep.mubr.bf16.mxu0 %v2455_v57 }
  0x64   : > { %1280 = vmatprep.mubr.bf16.mxu1 %v2457_v58 }
  0x6a   : > { %1120 = vmatmul.mubr.bf16.gmra.mrb[24].mxu0 %v2459_v59 }
  0x6b   : > { %1281 = vmatmul.mubr.bf16.gmra.mrb[24].mxu1 %v2460_v60  ;;  %1127 = vmatprep.mubr.bf16.mxu0 %v2461_v61 }
  0x6c   : > { %1288 = vmatprep.mubr.bf16.mxu1 %v2463_v62 }
  0x72   : > { %1128 = vmatmul.mubr.bf16.gmra.mrb[28].mxu0 %v2465_v63 }
  0x73   : > { %1289 = vmatmul.mubr.bf16.gmra.mrb[28].mxu1 %v2466_v0  ;;  %1135 = vmatprep.mubr.bf16.mxu0 %v2467_v1 }
  0x74   : > { %1296 = vmatprep.mubr.bf16.mxu1 %v2469_v2 }
  0x7a   : > { %1136 = vmatmul.mubr.bf16.gmra.mrb[32].mxu0 %v2471_v3 }
  0x7b   : > { %1297 = vmatmul.mubr.bf16.gmra.mrb[32].mxu1 %v2472_v4  ;;  %1143 = vmatprep.mubr.bf16.mxu0 %v2473_v5 }
  0x7c   : > { %1304 = vmatprep.mubr.bf16.mxu1 %v2475_v6 }
  0x82   : > { %1144 = vmatmul.mubr.bf16.gmra.mrb[36].mxu0 %v2477_v7 }
  0x83   : > { %1305 = vmatmul.mubr.bf16.gmra.mrb[36].mxu1 %v2478_v8  ;;  %1151 = vmatprep.mubr.bf16.mxu0 %v2479_v9 }
  0x84   : > { %1312 = vmatprep.mubr.bf16.mxu1 %v2481_v10 }
  0x8a   : > { %1152 = vmatmul.mubr.bf16.gmra.mrb[40].mxu0 %v2483_v11 }
  0x8b   : > { %1313 = vmatmul.mubr.bf16.gmra.mrb[40].mxu1 %v2484_v12  ;;  %1159 = vmatprep.mubr.bf16.mxu0 %v2485_v13 }
  0x8c   : > { %1320 = vmatprep.mubr.bf16.mxu1 %v2487_v14 }
  0x92   : > { %1160 = vmatmul.mubr.bf16.gmra.mrb[44].mxu0 %v2489_v15 }
  0x93   : > { %1321 = vmatmul.mubr.bf16.gmra.mrb[44].mxu1 %v2490_v16  ;;  %1167 = vmatprep.mubr.bf16.mxu0 %v2491_v17 }
  0x94   : > { %1328 = vmatprep.mubr.bf16.mxu1 %v2493_v18 }
  0x9a   : > { %1168 = vmatmul.mubr.bf16.gmra.mrb[48].mxu0 %v2495_v19 }
  0x9b   : > { %1329 = vmatmul.mubr.bf16.gmra.mrb[48].mxu1 %v2496_v20  ;;  %1175 = vmatprep.mubr.bf16.mxu0 %v2497_v21 }
  0x9c   : > { %1336 = vmatprep.mubr.bf16.mxu1 %v2499_v22 }
  0xa2   : > { %1176 = vmatmul.mubr.bf16.gmra.mrb[52].mxu0 %v2501_v23 }
  0xa3   : > { %1337 = vmatmul.mubr.bf16.gmra.mrb[52].mxu1 %v2502_v24  ;;  %1183 = vmatprep.mubr.bf16.mxu0 %v2503_v25 }
  0xa4   : > { %1344 = vmatprep.mubr.bf16.mxu1 %v2505_v26 }
  0xaa   : > { %1184 = vmatmul.mubr.bf16.gmra.mrb[56].mxu0 %v2507_v27 }
  0xab   : > { %1345 = vmatmul.mubr.bf16.gmra.mrb[56].mxu1 %v2508_v28  ;;  %1191 = vmatprep.mubr.bf16.mxu0 %v2509_v29 }
  0xac   : > { %1352 = vmatprep.mubr.bf16.mxu1 %v2511_v30 }
  0xb2   : > { %1192 = vmatmul.mubr.bf16.gmra.mrb[60].mxu0 %v2513_v31 }
  0xb3   : > { %1353 = vmatmul.mubr.bf16.gmra.mrb[60].mxu1 %v2514_v32  ;;  %1719 = vmatprep.mubr.bf16.mxu0 %v2020_v51 }
 0x10d   : > { %v2100_v33 = vpop.f32.mrb[0].mxu0 }
 0x10e   : > { %v2212_v34 = vpop.f32.mrb[0].mxu1  ;;  %v2101_v35 = vpop.f32.mrb[1].mxu0 }
 0x10f   : > { %v2102_v36 = vadd.f32 %v2101_v35, %v2100_v33  ;;  %v2213_v37 = vpop.f32.mrb[1].mxu1  ;;  %v2103_v38 = vpop.f32.mrb[2].mxu0 }
 0x110   : > { %v2214_v39 = vadd.f32 %v2213_v37, %v2212_v34  ;;  %v2215_v40 = vpop.f32.mrb[2].mxu1  ;;  %v2104_v41 = vpop.f32.mrb[3].mxu0 }
 0x111   : > { %v2105_v43 = vadd.f32 %v2104_v41, %v2103_v38  ;;  %v2216_v44 = vpop.f32.mrb[3].mxu1 }
 0x112   : > { %v1235_v45 = vadd.f32 %v2214_v39, %v2102_v36  ;;  %v2217_v46 = vadd.f32 %v2216_v44, %v2215_v40 }
 0x114   : > { %v1467_v47 = vadd.f32 %v2790_v42, %v1235_v45  ;;  %v1238_v48 = vadd.f32 %v2217_v46, %v2105_v43 }
 0x115   : > { %v2106_v50 = vpop.f32.mrb[4].mxu0 }
 0x116   : > { %v1468_v52 = vadd.f32 %v2790_v42, %v1238_v48  ;;  %v2218_v53 = vpop.f32.mrb[4].mxu1  ;;  %v2107_v54 = vpop.f32.mrb[5].mxu0  ;;  %v1499_v58 = vmax.f32 %v1467_v47, 0.0 }
 0x117   : > { %v2108_v55 = vadd.f32 %v2107_v54, %v2106_v50  ;;  %v2219_v56 = vpop.f32.mrb[5].mxu1  ;;  %v2109_v57 = vpop.f32.mrb[6].mxu0 }
 0x118   : > { %v1500_v59 = vmax.f32 %v1468_v52, 0.0  ;;  %v2220_v60 = vadd.f32 %v2219_v56, %v2218_v53  ;;  %v2221_v61 = vpop.f32.mrb[6].mxu1  ;;  %v2110_v62 = vpop.f32.mrb[7].mxu0 }
 0x119   : > { %v2111_v63 = vadd.f32 %v2110_v62, %v2109_v57  ;;  %v2222_v0 = vpop.f32.mrb[7].mxu1 }
 0x11a   : > { %v2799_v1 = vpack.c.bf16 %v1500_v59, %v1499_v58  ;;  %v1243_v2 = vadd.f32 %v2220_v60, %v2108_v55  ;;  %v2223_v3 = vadd.f32 %v2222_v0, %v2221_v61 }
 0x11c   : > { %v1469_v4 = vadd.f32 %v2790_v42, %v1243_v2  ;;  %v1246_v5 = vadd.f32 %v2223_v3, %v2111_v63 }
 0x11d   : > { %v2112_v6 = vpop.f32.mrb[8].mxu0 }
 0x11e   : > { %v1470_v7 = vadd.f32 %v2790_v42, %v1246_v5  ;;  %v2224_v8 = vpop.f32.mrb[8].mxu1  ;;  %v2113_v9 = vpop.f32.mrb[9].mxu0  ;;  %v1501_v13 = vmax.f32 %v1469_v4, 0.0 }
 0x11f   : > { %v2114_v10 = vadd.f32 %v2113_v9, %v2112_v6  ;;  %v2225_v11 = vpop.f32.mrb[9].mxu1  ;;  %v2115_v12 = vpop.f32.mrb[10].mxu0 }
 0x120   : > { %v1502_v14 = vmax.f32 %v1470_v7, 0.0  ;;  %v2226_v15 = vadd.f32 %v2225_v11, %v2224_v8  ;;  %v2227_v16 = vpop.f32.mrb[10].mxu1  ;;  %v2116_v17 = vpop.f32.mrb[11].mxu0 }
 0x121   : > { %v2117_v18 = vadd.f32 %v2116_v17, %v2115_v12  ;;  %v2228_v19 = vpop.f32.mrb[11].mxu1 }
 0x122   : > { %v2803_v20 = vpack.c.bf16 %v1502_v14, %v1501_v13  ;;  %v1251_v21 = vadd.f32 %v2226_v15, %v2114_v10  ;;  %v2229_v22 = vadd.f32 %v2228_v19, %v2227_v16 }
 0x124   : > { %v1471_v23 = vadd.f32 %v2790_v42, %v1251_v21  ;;  %v1254_v24 = vadd.f32 %v2229_v22, %v2117_v18 }
 0x125   : > { %v2118_v25 = vpop.f32.mrb[12].mxu0 }
 0x126   : > { %v1472_v26 = vadd.f32 %v2790_v42, %v1254_v24  ;;  %v2230_v27 = vpop.f32.mrb[12].mxu1  ;;  %v2119_v28 = vpop.f32.mrb[13].mxu0  ;;  %v1503_v32 = vmax.f32 %v1471_v23, 0.0 }
 0x127   : > { %v2120_v29 = vadd.f32 %v2119_v28, %v2118_v25  ;;  %v2231_v30 = vpop.f32.mrb[13].mxu1  ;;  %v2121_v31 = vpop.f32.mrb[14].mxu0 }
 0x128   : > { %v1504_v33 = vmax.f32 %v1472_v26, 0.0  ;;  %v2232_v34 = vadd.f32 %v2231_v30, %v2230_v27  ;;  %v2233_v35 = vpop.f32.mrb[14].mxu1  ;;  %v2122_v36 = vpop.f32.mrb[15].mxu0 }
 0x129   : > { %v2123_v37 = vadd.f32 %v2122_v36, %v2121_v31  ;;  %v2234_v38 = vpop.f32.mrb[15].mxu1 }
 0x12a   : > { %v2807_v39 = vpack.c.bf16 %v1504_v33, %v1503_v32  ;;  %v1259_v40 = vadd.f32 %v2232_v34, %v2120_v29  ;;  %v2235_v41 = vadd.f32 %v2234_v38, %v2233_v35 }
 0x12c   : > { %v1473_v43 = vadd.f32 %v2790_v42, %v1259_v40  ;;  %v1262_v44 = vadd.f32 %v2235_v41, %v2123_v37 }
 0x12d   : > { %v2124_v45 = vpop.f32.mrb[16].mxu0 }
 0x12e   : > { %v1474_v46 = vadd.f32 %v2790_v42, %v1262_v44  ;;  %v2236_v47 = vpop.f32.mrb[16].mxu1  ;;  %v2125_v48 = vpop.f32.mrb[17].mxu0  ;;  %v1505_v53 = vmax.f32 %v1473_v43, 0.0  ;;  %v1532_v44 = vlaneseq }
 0x12f   : > { %v2126_v50 = vadd.f32 %v2125_v48, %v2124_v45  ;;  %v2237_v51 = vpop.f32.mrb[17].mxu1  ;;  %v2127_v52 = vpop.f32.mrb[18].mxu0 }
 0x130   : > { %v1506_v54 = vmax.f32 %v1474_v46, 0.0  ;;  %v2238_v55 = vadd.f32 %v2237_v51, %v2236_v47  ;;  %v2239_v56 = vpop.f32.mrb[18].mxu1  ;;  %v2128_v57 = vpop.f32.mrb[19].mxu0 }
 0x131   : > { %v2129_v58 = vadd.f32 %v2128_v57, %v2127_v52  ;;  %v2240_v59 = vpop.f32.mrb[19].mxu1 }
 0x132   : > { %v2811_v60 = vpack.c.bf16 %v1506_v54, %v1505_v53  ;;  %v1267_v61 = vadd.f32 %v2238_v55, %v2126_v50  ;;  %v2241_v62 = vadd.f32 %v2240_v59, %v2239_v56  ;;  %v2823_v59 = vshrl.u32 %v1532_v44, 7 }
 0x134   : > { %v1475_v63 = vadd.f32 %v2790_v42, %v1267_v61  ;;  %v1270_v0 = vadd.f32 %v2241_v62, %v2129_v58  ;;  %v1535_v44 = vadd.s32 16, %v2823_v59 }
 0x135   : > { %v2130_v2 = vpop.f32.mrb[20].mxu0 }
 0x136   : > { %v1476_v3 = vadd.f32 %v2790_v42, %v1270_v0  ;;  %v2242_v4 = vpop.f32.mrb[20].mxu1  ;;  %v2131_v5 = vpop.f32.mrb[21].mxu0  ;;  %v1507_v9 = vmax.f32 %v1475_v63, 0.0 }
 0x137   : > { %v2132_v6 = vadd.f32 %v2131_v5, %v2130_v2  ;;  %v2243_v7 = vpop.f32.mrb[21].mxu1  ;;  %v2133_v8 = vpop.f32.mrb[22].mxu0  ;;  %v1550_v5 = vadd.s32 136, %v2823_v59 }
 0x138   : > { %v1508_v10 = vmax.f32 %v1476_v3, 0.0  ;;  %v2244_v11 = vadd.f32 %v2243_v7, %v2242_v4  ;;  %v2245_v12 = vpop.f32.mrb[22].mxu1  ;;  %v2134_v13 = vpop.f32.mrb[23].mxu0  ;;  %v1549_v4 = vadd.s32 128, %v2823_v59 }
 0x139   : > { %v2135_v14 = vadd.f32 %v2134_v13, %v2133_v8  ;;  %v2246_v15 = vpop.f32.mrb[23].mxu1  ;;  %v1534_v13 = vadd.s32 8, %v2823_v59 }
 0x13a   : > { %v2815_v16 = vpack.c.bf16 %v1508_v10, %v1507_v9  ;;  %v1275_v17 = vadd.f32 %v2244_v11, %v2132_v6  ;;  %v2247_v18 = vadd.f32 %v2246_v15, %v2245_v12  ;;  %v2832_v9 = vstv %s2018_s10 }
 0x13c   : > { %v1477_v19 = vadd.f32 %v2790_v42, %v1275_v17  ;;  %v1278_v21 = vadd.f32 %v2247_v18, %v2135_v14 }
 0x13d   : > { %v2136_v22 = vpop.f32.mrb[24].mxu0 }
 0x13e   : > { %v1478_v23 = vadd.f32 %v2790_v42, %v1278_v21  ;;  %v2248_v24 = vpop.f32.mrb[24].mxu1  ;;  %v2137_v25 = vpop.f32.mrb[25].mxu0  ;;  %v1509_v29 = vmax.f32 %v1477_v19, 0.0 }
 0x13f   : > { %v2138_v26 = vadd.f32 %v2137_v25, %v2136_v22  ;;  %v2249_v27 = vpop.f32.mrb[25].mxu1  ;;  %v2139_v28 = vpop.f32.mrb[26].mxu0 }
 0x140   : > { %v1510_v30 = vmax.f32 %v1478_v23, 0.0  ;;  %v2250_v31 = vadd.f32 %v2249_v27, %v2248_v24  ;;  %v2251_v32 = vpop.f32.mrb[26].mxu1  ;;  %v2140_v33 = vpop.f32.mrb[27].mxu0  ;;  %v1582_v23 = vadd.s32 %v2832_v9, %v1549_v4  ;;  %v1583_v24 = vadd.s32 %v2832_v9, %v1550_v5 }
 0x141   : > { %v2141_v34 = vadd.f32 %v2140_v33, %v2139_v28  ;;  %v2252_v35 = vpop.f32.mrb[27].mxu1  ;;  %v1566_v28 = vadd.s32 %v2832_v9, %v2823_v59  ;;  %v1551_v33 = vadd.s32 144, %v2823_v59  ;;  %v1553_v4 = vadd.s32 160, %v2823_v59 }
 0x142   : > { %v2819_v36 = vpack.c.bf16 %v1510_v30, %v1509_v29  ;;  %v1283_v37 = vadd.f32 %v2250_v31, %v2138_v26  ;;  %v2253_v38 = vadd.f32 %v2252_v35, %v2251_v32  ;;  %v1567_v29 = vadd.s32 %v2832_v9, %v1534_v13 }
 0x143   : > { %vm1614_vm0 = vcmp.lt.s32.totalorder %v1582_v23, 16  ;;  %vm1615_vm1 = vcmp.lt.s32.totalorder %v1583_v24, 16  ;;  %vm1598_vm2 = vcmp.lt.s32.totalorder %v1566_v28, 16  ;;  %v1554_v5 = vadd.s32 168, %v2823_v59 }
 0x144   : > { %v1479_v40 = vadd.f32 %v2790_v42, %v1283_v37  ;;  %v1286_v41 = vadd.f32 %v2253_v38, %v2141_v34  ;;  %v1552_v38 = vadd.s32 152, %v2823_v59  ;;  %vm1599_vm3 = vcmp.lt.s32.totalorder %v1567_v29, 16  ;;  %vm2045_vm4 = vmpackc.low %vm1615_vm1, %vm1614_vm0 }
 0x145   : > { %v2142_v43 = vpop.f32.mrb[28].mxu0  ;;  %vm2021_vm5 = vmpackc.low %vm1599_vm3, %vm1598_vm2  ;;  %v1586_v23 = vadd.s32 %v2832_v9, %v1553_v4  ;;  %v1587_v24 = vadd.s32 %v2832_v9, %v1554_v5  ;;  %v1557_v4 = vadd.s32 192, %v2823_v59  ;;  %v1558_v5 = vadd.s32 200, %v2823_v59 }
 0x146   : > { %v1480_v45 = vadd.f32 %v2790_v42, %v1286_v41  ;;  %v2254_v46 = vpop.f32.mrb[28].mxu1  ;;  %v2143_v47 = vpop.f32.mrb[29].mxu0  ;;  %v1511_v52 = vmax.f32 %v1479_v40, 0.0 }
 0x147   : > { %v2144_v48 = vadd.f32 %v2143_v47, %v2142_v43  ;;  %v2255_v50 = vpop.f32.mrb[29].mxu1  ;;  %v2145_v51 = vpop.f32.mrb[30].mxu0  ;;  %vm1618_vm12 = vcmp.lt.s32.totalorder %v1586_v23, 16  ;;  %vm1619_vm13 = vcmp.lt.s32.totalorder %v1587_v24, 16  ;;  %v1591_v23 = vadd.s32 %v2832_v9, %v1558_v5 }
 0x148   : > { %v1512_v53 = vmax.f32 %v1480_v45, 0.0  ;;  %v2256_v54 = vadd.f32 %v2255_v50, %v2254_v46  ;;  %v2257_v55 = vpop.f32.mrb[30].mxu1  ;;  %v2146_v56 = vpop.f32.mrb[31].mxu0  ;;  %v1536_v45 = vadd.s32 24, %v2823_v59  ;;  %vm2051_vm0 = vmpackc.low %vm1619_vm13, %vm1618_vm12 }
 0x149   : > { %v2147_v57 = vadd.f32 %v2146_v56, %v2145_v51  ;;  %v2258_v58 = vpop.f32.mrb[31].mxu1 }
 0x14a   : > { %v2825_v61 = vpack.c.bf16 %v1512_v53, %v1511_v52  ;;  %v1291_v62 = vadd.f32 %v2256_v54, %v2144_v48  ;;  %v2259_v63 = vadd.f32 %v2258_v58, %v2257_v55  ;;  %v1584_v54 = vadd.s32 %v2832_v9, %v1551_v33 }
 0x14b   : > { %v1585_v58 = vadd.s32 %v2832_v9, %v1552_v38 }
 0x14c   : > { %v1481_v0 = vadd.f32 %v2790_v42, %v1291_v62  ;;  %v1294_v2 = vadd.f32 %v2259_v63, %v2147_v57  ;;  %v1568_v62 = vadd.s32 %v2832_v9, %v1535_v44  ;;  %v1569_v63 = vadd.s32 %v2832_v9, %v1536_v45 }
 0x14d   : > { %v2148_v3 = vpop.f32.mrb[32].mxu0  ;;  %vm1616_vm6 = vcmp.lt.s32.totalorder %v1584_v54, 16  ;;  %vm1617_vm7 = vcmp.lt.s32.totalorder %v1585_v58, 16  ;;  %v1539_v45 = vadd.s32 48, %v2823_v59 }
 0x14e   : > { %v1482_v6 = vadd.f32 %v2790_v42, %v1294_v2  ;;  %v2260_v7 = vpop.f32.mrb[32].mxu1  ;;  %v2149_v8 = vpop.f32.mrb[33].mxu0  ;;  %v1513_v14 = vmax.f32 %v1481_v0, 0.0  ;;  %vm1600_vm8 = vcmp.lt.s32.totalorder %v1568_v62, 16  ;;  %vm1601_vm9 = vcmp.lt.s32.totalorder %v1569_v63, 16  ;;  %vm2048_vm10 = vmpackc.low %vm1617_vm7, %vm1616_vm6 }
 0x14f   : > { %v2150_v10 = vadd.f32 %v2149_v8, %v2148_v3  ;;  %v2261_v11 = vpop.f32.mrb[33].mxu1  ;;  %v2151_v12 = vpop.f32.mrb[34].mxu0  ;;  %vm2024_vm11 = vmpackc.low %vm1601_vm9, %vm1600_vm8  ;;  %v1572_v62 = vadd.s32 %v2832_v9, %v1539_v45  ;;  %vm1623_vm9 = vcmp.lt.s32.totalorder %v1591_v23, 16 }
 0x150   : > { %v1514_v15 = vmax.f32 %v1482_v6, 0.0  ;;  %v2262_v17 = vadd.f32 %v2261_v11, %v2260_v7  ;;  %v2263_v18 = vpop.f32.mrb[34].mxu1  ;;  %v2152_v19 = vpop.f32.mrb[35].mxu0 }
 0x151   : > { %v2153_v21 = vadd.f32 %v2152_v19, %v2151_v12  ;;  %v2264_v22 = vpop.f32.mrb[35].mxu1 }
 0x152   : > { %v2837_v25 = vpack.c.bf16 %v1514_v15, %v1513_v14  ;;  %v1299_v26 = vadd.f32 %v2262_v17, %v2150_v10  ;;  %v2265_v27 = vadd.f32 %v2264_v22, %v2263_v18  ;;  %v1537_v10 = vadd.s32 32, %v2823_v59 }
 0x154   : > { %v1483_v30 = vadd.f32 %v2790_v42, %v1299_v26  ;;  %v1302_v31 = vadd.f32 %v2265_v27, %v2153_v21  ;;  %v1570_v29 = vadd.s32 %v2832_v9, %v1537_v10  ;;  %v1541_v10 = vadd.s32 64, %v2823_v59 }
 0x155   : > { %v2154_v32 = vpop.f32.mrb[36].mxu0 }
 0x156   : > { %v1484_v34 = vadd.f32 %v2790_v42, %v1302_v31  ;;  %v2266_v35 = vpop.f32.mrb[36].mxu1  ;;  %v2155_v37 = vpop.f32.mrb[37].mxu0  ;;  %v1515_v46 = vmax.f32 %v1483_v30, 0.0  ;;  %vm1602_vm14 = vcmp.lt.s32.totalorder %v1570_v29, 16 }
 0x157   : > { %v2156_v40 = vadd.f32 %v2155_v37, %v2154_v32  ;;  %v2267_v41 = vpop.f32.mrb[37].mxu1  ;;  %v2157_v43 = vpop.f32.mrb[38].mxu0 }
 0x158   : > { %v1516_v47 = vmax.f32 %v1484_v34, 0.0  ;;  %v2268_v48 = vadd.f32 %v2267_v41, %v2266_v35  ;;  %v2269_v50 = vpop.f32.mrb[38].mxu1  ;;  %v2158_v51 = vpop.f32.mrb[39].mxu0  ;;  %v1555_v34 = vadd.s32 176, %v2823_v59 }
 0x159   : > { %v2159_v52 = vadd.f32 %v2158_v51, %v2157_v43  ;;  %v2270_v53 = vpop.f32.mrb[39].mxu1 }
 0x15a   : > { %v2046_v55 = vpack.c.bf16 %v1516_v47, %v1515_v46  ;;  %v1307_v56 = vadd.f32 %v2268_v48, %v2156_v40  ;;  %v2271_v57 = vadd.f32 %v2270_v53, %v2269_v50  ;;  %v1556_v40 = vadd.s32 184, %v2823_v59 }
 0x15b   : > { %v1588_v54 = vadd.s32 %v2832_v9, %v1555_v34 }
 0x15c   : > { %v1485_v0 = vadd.f32 %v2790_v42, %v1307_v56  ;;  %v1310_v2 = vadd.f32 %v2271_v57, %v2159_v52  ;;  %2308 = vmatprep.subr.msk.bf16.mxu0 %vm2045_vm4, %v2046_v55  ;;  %v1589_v58 = vadd.s32 %v2832_v9, %v1556_v40  ;;  %vm1604_vm4 = vcmp.lt.s32.totalorder %v1572_v62, 16 }
 0x15d   : > { %2309 = vmatpush3.bf16.msk.msra.mxu0 %vm2021_vm5, %v2799_v1  ;;  %v2160_v3 = vpop.f32.mrb[40].mxu0  ;;  %v1538_v1 = vadd.s32 40, %v2823_v59  ;;  %vm1620_vm2 = vcmp.lt.s32.totalorder %v1588_v54, 16 }
 0x15e   : > { %v1486_v6 = vadd.f32 %v2790_v42, %v1310_v2  ;;  %v2272_v7 = vpop.f32.mrb[40].mxu1  ;;  %v2161_v8 = vpop.f32.mrb[41].mxu0  ;;  %v1517_v14 = vmax.f32 %v1485_v0, 0.0  ;;  %vm1621_vm3 = vcmp.lt.s32.totalorder %v1589_v58, 16 }
 0x15f   : > { %v2162_v11 = vadd.f32 %v2161_v8, %v2160_v3  ;;  %v2273_v12 = vpop.f32.mrb[41].mxu1  ;;  %v2163_v13 = vpop.f32.mrb[42].mxu0  ;;  %v1571_v30 = vadd.s32 %v2832_v9, %v1538_v1  ;;  %vm2054_vm6 = vmpackc.low %vm1621_vm3, %vm1620_vm2 }
 0x160   : > { %v1518_v15 = vmax.f32 %v1486_v6, 0.0  ;;  %v2274_v17 = vadd.f32 %v2273_v12, %v2272_v7  ;;  %v2275_v18 = vpop.f32.mrb[42].mxu1  ;;  %v2164_v19 = vpop.f32.mrb[43].mxu0 }
 0x161   : > { %v2165_v21 = vadd.f32 %v2164_v19, %v2163_v13  ;;  %v2276_v22 = vpop.f32.mrb[43].mxu1  ;;  %vm1603_vm15 = vcmp.lt.s32.totalorder %v1571_v30, 16 }
 0x162   : > { %v2049_v26 = vpack.c.bf16 %v1518_v15, %v1517_v14  ;;  %v1315_v27 = vadd.f32 %v2274_v17, %v2162_v11  ;;  %v2277_v28 = vadd.f32 %v2276_v22, %v2275_v18  ;;  %vm2027_vm1 = vmpackc.low %vm1603_vm15, %vm1602_vm14  ;;  %v1590_v22 = vadd.s32 %v2832_v9, %v1557_v4 }
 0x164   : > { %v1487_v31 = vadd.f32 %v2790_v42, %v1315_v27  ;;  %v1318_v32 = vadd.f32 %v2277_v28, %v2165_v21  ;;  %2310 = vmatprep.subr.msk.bf16.mxu0 %vm2048_vm10, %v2049_v26  ;;  %v1574_v28 = vadd.s32 %v2832_v9, %v1541_v10  ;;  %vm1622_vm8 = vcmp.lt.s32.totalorder %v1590_v22, 16 }
 0x165   : > { %2311 = vmatpush3.bf16.msk.msra.mxu0 %vm2024_vm11, %v2803_v20  ;;  %v2166_v33 = vpop.f32.mrb[44].mxu0  ;;  %v1540_v20 = vadd.s32 56, %v2823_v59  ;;  %vm2057_vm12 = vmpackc.low %vm1623_vm9, %vm1622_vm8 }
 0x166   : > { %v1488_v35 = vadd.f32 %v2790_v42, %v1318_v32  ;;  %v2278_v37 = vpop.f32.mrb[44].mxu1  ;;  %v2167_v38 = vpop.f32.mrb[45].mxu0  ;;  %v1519_v46 = vmax.f32 %v1487_v31, 0.0  ;;  %vm1606_vm10 = vcmp.lt.s32.totalorder %v1574_v28, 16 }
 0x167   : > { %v2168_v41 = vadd.f32 %v2167_v38, %v2166_v33  ;;  %v2279_v43 = vpop.f32.mrb[45].mxu1  ;;  %v2169_v44 = vpop.f32.mrb[46].mxu0  ;;  %v1573_v63 = vadd.s32 %v2832_v9, %v1540_v20  ;;  %v1559_v33 = vadd.s32 208, %v2823_v59  ;;  %v1560_v38 = vadd.s32 216, %v2823_v59 }
 0x168   : > { %v1520_v47 = vmax.f32 %v1488_v35, 0.0  ;;  %v2280_v48 = vadd.f32 %v2279_v43, %v2278_v37  ;;  %v2281_v50 = vpop.f32.mrb[46].mxu1  ;;  %v2170_v51 = vpop.f32.mrb[47].mxu0 }
 0x169   : > { %v2171_v52 = vadd.f32 %v2170_v51, %v2169_v44  ;;  %v2282_v53 = vpop.f32.mrb[47].mxu1  ;;  %vm1605_vm5 = vcmp.lt.s32.totalorder %v1573_v63, 16  ;;  %v1543_v44 = vadd.s32 80, %v2823_v59 }
 0x16a   : > { %v2052_v55 = vpack.c.bf16 %v1520_v47, %v1519_v46  ;;  %v1323_v56 = vadd.f32 %v2280_v48, %v2168_v41  ;;  %v2283_v57 = vadd.f32 %v2282_v53, %v2281_v50  ;;  %vm2030_vm7 = vmpackc.low %vm1605_vm5, %vm1604_vm4 }
 0x16c   : > { %v1489_v0 = vadd.f32 %v2790_v42, %v1323_v56  ;;  %v1326_v2 = vadd.f32 %v2283_v57, %v2171_v52  ;;  %2312 = vmatprep.subr.msk.bf16.mxu0 %vm2051_vm0, %v2052_v55  ;;  %v1592_v52 = vadd.s32 %v2832_v9, %v1559_v33  ;;  %v1593_v56 = vadd.s32 %v2832_v9, %v1560_v38 }
 0x16d   : > { %2313 = vmatpush3.bf16.msk.msra.mxu0 %vm2027_vm1, %v2807_v39  ;;  %v2172_v3 = vpop.f32.mrb[48].mxu0  ;;  %v1542_v39 = vadd.s32 72, %v2823_v59  ;;  %v1576_v57 = vadd.s32 %v2832_v9, %v1543_v44 }
 0x16e   : > { %v1490_v6 = vadd.f32 %v2790_v42, %v1326_v2  ;;  %v2284_v7 = vpop.f32.mrb[48].mxu1  ;;  %v2173_v8 = vpop.f32.mrb[49].mxu0  ;;  %v1521_v1 = vmax.f32 %v1489_v0, 0.0  ;;  %v1561_v2 = vadd.s32 224, %v2823_v59  ;;  %vm1624_vm14 = vcmp.lt.s32.totalorder %v1592_v52, 16 }
 0x16f   : > { %v2174_v11 = vadd.f32 %v2173_v8, %v2172_v3  ;;  %v2285_v12 = vpop.f32.mrb[49].mxu1  ;;  %v2175_v13 = vpop.f32.mrb[50].mxu0  ;;  %v1575_v29 = vadd.s32 %v2832_v9, %v1542_v39  ;;  %v1562_v3 = vadd.s32 232, %v2823_v59  ;;  %vm1625_vm15 = vcmp.lt.s32.totalorder %v1593_v56, 16 }
 0x170   : > { %v1522_v14 = vmax.f32 %v1490_v6, 0.0  ;;  %v2286_v15 = vadd.f32 %v2285_v12, %v2284_v7  ;;  %v2287_v17 = vpop.f32.mrb[50].mxu1  ;;  %v2176_v18 = vpop.f32.mrb[51].mxu0  ;;  %v1545_v7 = vadd.s32 96, %v2823_v59  ;;  %vm1608_vm0 = vcmp.lt.s32.totalorder %v1576_v57, 16  ;;  %vm2060_vm2 = vmpackc.low %vm1625_vm15, %vm1624_vm14 }
 0x171   : > { %v2177_v19 = vadd.f32 %v2176_v18, %v2175_v13  ;;  %v2288_v21 = vpop.f32.mrb[51].mxu1  ;;  %vm1607_vm11 = vcmp.lt.s32.totalorder %v1575_v29, 16  ;;  %v1594_v18 = vadd.s32 %v2832_v9, %v1561_v2 }
 0x172   : > { %v2055_v24 = vpack.c.bf16 %v1522_v14, %v1521_v1  ;;  %v1331_v26 = vadd.f32 %v2286_v15, %v2174_v11  ;;  %v2289_v27 = vadd.f32 %v2288_v21, %v2287_v17  ;;  %vm2033_vm13 = vmpackc.low %vm1607_vm11, %vm1606_vm10 }
 0x173   : > { %vm1626_vm4 = vcmp.lt.s32.totalorder %v1594_v18, 16 }
 0x174   : > { %v1491_v30 = vadd.f32 %v2790_v42, %v1331_v26  ;;  %v1334_v31 = vadd.f32 %v2289_v27, %v2177_v19  ;;  %2314 = vmatprep.subr.msk.bf16.mxu0 %vm2054_vm6, %v2055_v24  ;;  %v1595_v19 = vadd.s32 %v2832_v9, %v1562_v3  ;;  %v1578_v24 = vadd.s32 %v2832_v9, %v1545_v7  ;;  %v2519_v7 = vld [vmem:[%s3000_s5 + $0x8] sm:$0xff] (%p1729_p7)  }
 0x175   : > { %2315 = vmatpush3.bf16.msk.msra.mxu0 %vm2030_vm7, %v2811_v60  ;;  %v2178_v32 = vpop.f32.mrb[52].mxu0  ;;  %v1544_v60 = vadd.s32 88, %v2823_v59 }
 0x176   : > { %v1492_v34 = vadd.f32 %v2790_v42, %v1334_v31  ;;  %v2290_v35 = vpop.f32.mrb[52].mxu1  ;;  %v2179_v37 = vpop.f32.mrb[53].mxu0  ;;  %v1523_v45 = vmax.f32 %v1491_v30, 0.0  ;;  %v1563_v30 = vadd.s32 240, %v2823_v59  ;;  %vm1627_vm5 = vcmp.lt.s32.totalorder %v1595_v19, 16 }
 0x177   : > { %v2180_v40 = vadd.f32 %v2179_v37, %v2178_v32  ;;  %v2291_v41 = vpop.f32.mrb[53].mxu1  ;;  %v2181_v43 = vpop.f32.mrb[54].mxu0  ;;  %v1577_v58 = vadd.s32 %v2832_v9, %v1544_v60  ;;  %vm1610_vm6 = vcmp.lt.s32.totalorder %v1578_v24, 16  ;;  %vm2063_vm8 = vmpackc.low %vm1627_vm5, %vm1626_vm4 }
 0x178   : > { %v1524_v20 = vmax.f32 %v1492_v34, 0.0  ;;  %v2292_v46 = vadd.f32 %v2291_v41, %v2290_v35  ;;  %v2293_v47 = vpop.f32.mrb[54].mxu1  ;;  %v2182_v48 = vpop.f32.mrb[55].mxu0  ;;  %v1564_v34 = vadd.s32 248, %v2823_v59 }
 0x179   : > { %v2183_v50 = vadd.f32 %v2182_v48, %v2181_v43  ;;  %v2294_v51 = vpop.f32.mrb[55].mxu1  ;;  %vm1609_vm1 = vcmp.lt.s32.totalorder %v1577_v58, 16 }
 0x17a   : > { %v2058_v53 = vpack.c.bf16 %v1524_v20, %v1523_v45  ;;  %v1339_v54 = vadd.f32 %v2292_v46, %v2180_v40  ;;  %v2295_v55 = vadd.f32 %v2294_v51, %v2293_v47  ;;  %vm2036_vm3 = vmpackc.low %vm1609_vm1, %vm1608_vm0  ;;  %v1547_v40 = vadd.s32 112, %v2823_v59 }
 0x17b   : > { %v1596_v47 = vadd.s32 %v2832_v9, %v1563_v30  ;;  %vm2553_vm0 = vmmov (%p1729_p7), 0  }
 0x17c   : > { %v1493_v62 = vadd.f32 %v2790_v42, %v1339_v54  ;;  %v1342_v63 = vadd.f32 %v2295_v55, %v2183_v50  ;;  %2316 = vmatprep.subr.msk.bf16.mxu0 %vm2057_vm12, %v2058_v53  ;;  %v1580_v52 = vadd.s32 %v2832_v9, %v1547_v40 }
 0x17d   : > { %2317 = vmatpush3.bf16.msk.msra.mxu0 %vm2033_vm13, %v2815_v16  ;;  %v2184_v0 = vpop.f32.mrb[56].mxu0  ;;  %v1546_v16 = vadd.s32 104, %v2823_v59  ;;  %vm1628_vm10 = vcmp.lt.s32.totalorder %v1596_v47, 16 }
 0x17e   : > { %v1494_v4 = vadd.f32 %v2790_v42, %v1342_v63  ;;  %v2296_v5 = vpop.f32.mrb[56].mxu1  ;;  %v2185_v6 = vpop.f32.mrb[57].mxu0  ;;  %v1525_v12 = vmax.f32 %v1493_v62, 0.0  ;;  %vm1612_vm12 = vcmp.lt.s32.totalorder %v1580_v52, 16  ;;  %v1662_v63 = vld [vmem:[#allocation3] sm:$0xff] }
 0x17f   : > { %v2186_v8 = vadd.f32 %v2185_v6, %v2184_v0  ;;  %v2297_v10 = vpop.f32.mrb[57].mxu1  ;;  %v2187_v11 = vpop.f32.mrb[58].mxu0  ;;  %v1579_v26 = vadd.s32 %v2832_v9, %v1546_v16  ;;  %v2552_v6 = vmov (%p1729_p7), 0.0   ;;  %v2523_v16 = vld [vmem:[%s3000_s5 + $0x28] sm:$0xff] (%p1729_p7)  }
 0x180   : > { %v1526_v13 = vmax.f32 %v1494_v4, 0.0  ;;  %v2298_v39 = vadd.f32 %v2297_v10, %v2296_v5  ;;  %v2299_v1 = vpop.f32.mrb[58].mxu1  ;;  %v2188_v14 = vpop.f32.mrb[59].mxu0  ;;  %v1735_v5 = vld [vmem:[%s2999_s4] sm:$0xff] (%p1729_p7)  ;;  %v2521_v10 = vld [vmem:[%s3000_s5 + $0x18] sm:$0xff] (%p1729_p7)  }
 0x181   : > { %v2189_v15 = vadd.f32 %v2188_v14, %v2187_v11  ;;  %v2300_v17 = vpop.f32.mrb[59].mxu1  ;;  %vm1611_vm7 = vcmp.lt.s32.totalorder %v1579_v26, 16  ;;  %v2522_v11 = vld [vmem:[%s3000_s5 + $0x20] sm:$0xff] (%p1729_p7)  }
 0x182   : > { %v2061_v21 = vpack.c.bf16 %v1526_v13, %v1525_v12  ;;  %v1347_v22 = vadd.f32 %v2298_v39, %v2186_v8  ;;  %v2301_v23 = vadd.f32 %v2300_v17, %v2299_v1  ;;  %vm2039_vm9 = vmpackc.low %vm1611_vm7, %vm1610_vm6  ;;  %v2520_v8 = vld [vmem:[%s3000_s5 + $0x10] sm:$0xff] (%p1729_p7)   ;;  %v2525_v13 = vld [vmem:[%s3000_s5 + $0x38] sm:$0xff] (%p1729_p7)  }
 0x183   : > { %v2524_v12 = vld [vmem:[%s3000_s5 + $0x30] sm:$0xff] (%p1729_p7)   ;;  %v2070_v17 = vld [vmem:[%s3001_s6] ss:$0 sm:$0xff] (%p1729_p7) }
 0x184   : > { %v1495_v27 = vadd.f32 %v2790_v42, %v1347_v22  ;;  %v1350_v28 = vadd.f32 %v2301_v23, %v2189_v15  ;;  %2318 = vmatprep.subr.msk.bf16.mxu0 %vm2060_vm2, %v2061_v21 }
 0x185   : > { %2319 = vmatpush3.bf16.msk.msra.mxu0 %vm2036_vm3, %v2819_v36  ;;  %v2190_v29 = vpop.f32.mrb[60].mxu0  ;;  %v1548_v36 = vadd.s32 120, %v2823_v59  ;;  %v1597_v59 = vadd.s32 %v2832_v9, %v1564_v34 }
 0x186   : > { %v1496_v31 = vadd.f32 %v2790_v42, %v1350_v28  ;;  %v2302_v32 = vpop.f32.mrb[60].mxu1  ;;  %v2191_v33 = vpop.f32.mrb[61].mxu0  ;;  %v1527_v41 = vmax.f32 %v1495_v27, 0.0 }
 0x187   : > { %v2192_v35 = vadd.f32 %v2191_v33, %v2190_v29  ;;  %v2303_v37 = vpop.f32.mrb[61].mxu1  ;;  %v2193_v38 = vpop.f32.mrb[62].mxu0  ;;  %v1581_v53 = vadd.s32 %v2832_v9, %v1548_v36  ;;  %vm1629_vm11 = vcmp.lt.s32.totalorder %v1597_v59, 16  ;;  %v2019_v9 = vcombine.low %v2794_v49, %v2794_v49  ;;  %v2518_v49 = vld [vmem:[%s3000_s5] sm:$0xff] (%p1729_p7)  }
 0x188   : > { %v1528_v43 = vmax.f32 %v1496_v31, 0.0  ;;  %v2304_v44 = vadd.f32 %v2303_v37, %v2302_v32  ;;  %v2305_v60 = vpop.f32.mrb[62].mxu1  ;;  %v2194_v45 = vpop.f32.mrb[63].mxu0  ;;  %vm2066_vm14 = vmpackc.low %vm1629_vm11, %vm1628_vm10 }
 0x189   : > { %v2195_v20 = vadd.f32 %v2194_v45, %v2193_v38  ;;  %v2306_v46 = vpop.f32.mrb[63].mxu1  ;;  %vm1613_vm13 = vcmp.lt.s32.totalorder %v1581_v53, 16 }
 0x18a   : > { %v2064_v48 = vpack.c.bf16 %v1528_v43, %v1527_v41  ;;  %v1355_v50 = vadd.f32 %v2304_v44, %v2192_v35  ;;  %v2307_v51 = vadd.f32 %v2306_v46, %v2305_v60  ;;  %vm2042_vm15 = vmpackc.low %vm1613_vm13, %vm1612_vm12 }
 0x18c   : > { %v1497_v54 = vadd.f32 %v2790_v42, %v1355_v50  ;;  %v1358_v55 = vadd.f32 %v2307_v51, %v2195_v20  ;;  %2320 = vmatprep.subr.msk.bf16.mxu0 %vm2063_vm8, %v2064_v48 }
 0x18d   : > { %2321 = vmatpush3.bf16.msk.msra.mxu0 %vm2039_vm9, %v2825_v61 }
 0x18e   : > { %v1498_v56 = vadd.f32 %v2790_v42, %v1358_v55  ;;  %v1529_v57 = vmax.f32 %v1497_v54, 0.0 }
 0x190   : > { %v1530_v58 = vmax.f32 %v1498_v56, 0.0 }
 0x192   : > { %v2067_v62 = vpack.c.bf16 %v1530_v58, %v1529_v57 }
 0x194   : > { %2322 = vmatprep.subr.msk.bf16.mxu0 %vm2066_vm14, %v2067_v62 }
 0x195   : > { %2323 = vmatpush3.bf16.msk.msra.mxu0 %vm2042_vm15, %v2837_v25  ;;  %v2551_v25 = vmov (%p1729_p7), 0  }
 0x196   : > { %2517 = vset.pattern.permute.xlu0 (%p1729_p7), %v2551_v25  ;;  %2339 = vmatprep.subr.bf16.mxu0 (%p1729_p7), %v2552_v6 }
 0x197   : > { %1738 = vperm.xlu0 (%p1729_p7), %2517, %v1735_v5  }
 0x198   : > { %1720 = vmatmul.mubr.bf16.vlgmr.msra.gmra.mrb[64].mxu0 %v2019_v9 }
 0x199   : > { %2340 = vmatpush3.bf16.msra.mxu0 (%p1729_p7), %v2518_v49  ;;  %2355 = vmatprep.mubr.msk.bf16.mxu0 (%p1729_p7), %vm2553_vm0, %v2552_v6 }
 0x19a   : > { %2341 = vmatprep.subr.bf16.mxu0 (%p1729_p7), %v2552_v6 }
 0x19d   : > { %2342 = vmatpush3.bf16.msra.mxu0 (%p1729_p7), %v2519_v7 }
 0x19e   : > { %2343 = vmatprep.subr.bf16.mxu0 (%p1729_p7), %v2552_v6 }
 0x1a1   : > { %2344 = vmatpush3.bf16.msra.mxu0 (%p1729_p7), %v2520_v8 }
 0x1a2   : > { %2345 = vmatprep.subr.bf16.mxu0 (%p1729_p7), %v2552_v6 }
 0x1a5   : > { %2346 = vmatpush3.bf16.msra.mxu0 (%p1729_p7), %v2521_v10 }
 0x1a6   : > { %2347 = vmatprep.subr.bf16.mxu0 (%p1729_p7), %v2552_v6 }
 0x1a9   : > { %2348 = vmatpush3.bf16.msra.mxu0 (%p1729_p7), %v2522_v11 }
 0x1aa   : > { %2349 = vmatprep.subr.bf16.mxu0 (%p1729_p7), %v2552_v6 }
 0x1ad   : > { %2350 = vmatpush3.bf16.msra.mxu0 (%p1729_p7), %v2523_v16 }
 0x1ae   : > { %2351 = vmatprep.subr.bf16.mxu0 (%p1729_p7), %v2552_v6 }
 0x1b1   : > { %2352 = vmatpush3.bf16.msra.mxu0 (%p1729_p7), %v2524_v12 }
 0x1b2   : > { %2353 = vmatprep.subr.bf16.mxu0 (%p1729_p7), %v2552_v6 }
 0x1b5   : > { %2354 = vmatpush3.bf16.msra.mxu0 (%p1729_p7), %v2525_v13 }
 0x216   : > { %v1739_v1 = vpop.permute.xlu0 (%p1729_p7), %1738 }
 0x26b   : > { %v2324_v61 = vpop.f32.mrb[64].mxu0  ;;  %1733 = sbr.rel (!%p1729_p7) target bundleno = 852 (0x354), region = 64 }
 0x26c   : > { %v2325_v42 = vpop.f32.mrb[65].mxu0 }
 0x26d   : > { %v2326_v0 = vadd.f32 %v2325_v42, %v2324_v61  ;;  %v2327_v2 = vpop.f32.mrb[66].mxu0 }
 0x26e   : > { %v2328_v3 = vpop.f32.mrb[67].mxu0 }
 0x26f   : > { %v1727_v4 = vadd.f32 %v2326_v0, %v1662_v63 }
 0x271   : > { %1728 = vst [vmem:[#allocation3] sm:$0xff] %v1727_v4 }
 0x278   : > { %v1734_v39 = vld [vmem:[#allocation3] sm:$0xff] }
 0x279   : > { %v1741_v14 = vmul.f32 %v1739_v1, %v1734_v39 }
 0x27b   : > { %v1742_v15 = vpack.c.bf16 %v1741_v14, %v1741_v14 }
 0x27d   : > { %2356 = vmatmul.mubr.bf16.vlgmr.msra.gmra.mrb[0].mxu0 %v1742_v15 }
 0x350   : > { %v1848_v18 = vpop.f32.mrb[0].mxu0 }
 0x351   : > { %v1849_v19 = vadd.f32 %v2070_v17, %v1848_v18  ;;  %v2357_v21 = vpop.f32.mrb[1].mxu0 }
 0x352   : > { %v1851_v22 = vpop.f32.mrb[2].mxu0 }
 0x353   : > { %1854 = vst [vmem:[%s3002_s7] sm:$0xff] %v1849_v19  ;;  %v2358_v23 = vpop.f32.mrb[3].mxu0 }
 0x354 PF: > { %s17_s26 = sadd.s32 1, %s2548_s26   ;;  %s3003_s24 = smov %s2544_s25 }
 0x355   : > { %p14_p8 = scmp.ge.s32.totalorder %s17_s26, 4   ;;  %s3004_s25 = smov %s3006_s27 }
 0x357   :  { %16 = sbr.rel (!%p14_p8) target bundleno = 2 (0x2), region = 94 }

</bundles_post_ra>
